<compile_context>
chip_gen: v7x
topology: tpu7x:2x2x1
jax: 0.10.0
libtpu: 0.0.40
codegen_flags: <defaults>
</compile_context>

<pallas_src>
import jax
import jax.numpy as jnp
import numpy as np
from jax.experimental import pallas as pl
from jax.experimental.pallas import tpu as pltpu


def _pick_tile(n):
    """Largest pairwise tile that exactly divides N (keeps lanes 128-aligned)."""
    for t in (512, 256, 128):
        if n % t == 0:
            return t
    return n


def _make_kernel(C, N, T):
    nblk = N // T
    inv_total = 1.0 / (C * N)
    inv_n = 1.0 / N
    # torch.var (unbiased) gives NaN for a single element; keep that semantic.
    inv_nm1 = 1.0 / (N - 1) if N > 1 else float("nan")
    inv_c = 1.0 / C

    def kernel(x_ref, xt_ref, out_ref, dup_ref):
        x = x_ref[...]                                     # (C, N) f32

        # ---- fused global reductions: one traversal feeds four stats -----
        white = jnp.sum((x > 0.9).astype(jnp.float32)) * inv_total
        dark = jnp.sum((x < 0.1).astype(jnp.float32)) * inv_total
        brightp = jnp.sum((x > 0.8).astype(jnp.float32)) * inv_total
        sum_c = jnp.sum(x, axis=1, keepdims=True)          # (C, 1)
        brightness = jnp.sum(sum_c) * inv_total

        # ---- per-channel unbiased variance (two-pass, matches torch.var) --
        mean_c = sum_c * inv_n                             # (C, 1)
        cen = x - mean_c                                   # (C, N)
        var_c = jnp.sum(cen * cen, axis=1, keepdims=True) * inv_nm1
        color_var = jnp.sum(var_c) * inv_c

        # ---- unique pixel-color count == torch.unique(img, dim=1).shape[1]
        # Pixel j is a first occurrence iff no earlier pixel i < j has an
        # identical C-vector.  Tiled exact O(N^2) pairwise compare; tiles with
        # i_block > j_block are skipped (strict lower triangle).
        dup_ref[...] = jnp.zeros_like(dup_ref)
        ii = jax.lax.broadcasted_iota(jnp.int32, (T, T), 0)
        jj = jax.lax.broadcasted_iota(jnp.int32, (T, T), 1)
        tri = ii < jj                     # i<j mask for diagonal tiles (hoisted)

        @pl.loop(0, nblk)
        def _(ib):
            i0 = pl.multiple_of(ib * T, T)
            xi_t = xt_ref[pl.ds(i0, T), :]                 # (T, C) natural slice

            @pl.loop(0, nblk)
            def _(jb):
                @pl.when(jb >= ib)                         # triangular skip
                def _():
                    j0 = pl.multiple_of(jb * T, T)
                    xj = x_ref[:, pl.ds(j0, T)]            # (C, T)
                    eq = xi_t[:, 0:1] == xj[0:1, :]        # (T, T)
                    for c in range(1, C):
                        eq = jnp.logical_and(
                            eq, xi_t[:, c:c + 1] == xj[c:c + 1, :])
                    valid = jnp.logical_or(ib < jb, tri)   # global i < j
                    cnt = jnp.where(jnp.logical_and(eq, valid), 1.0, 0.0)
                    dup_ref[:, pl.ds(j0, T)] += jnp.sum(
                        cnt, axis=0, keepdims=True)        # (1, T)

        uniq = jnp.sum((dup_ref[...] == 0.0).astype(jnp.float32))

        # ---- pack the six per-image scalars into one lane-dense tile ------
        lane = jax.lax.broadcasted_iota(jnp.int32, out_ref.shape, 1)
        res = jnp.where(lane == 0, uniq, 0.0)
        for k, v in enumerate((color_var, brightness, white, dark, brightp), 1):
            res = jnp.where(lane == k, v, res)
        out_ref[...] = res

    return kernel


def improved_empty_image_detector(x):
    """x: (B, C, H, W) float32. Returns the 6 per-image statistics
    (unique-color count as int32 instead of torch's int64)."""
    B, C, H, W = x.shape
    N = H * W
    xr = x.reshape(B, C, N).astype(jnp.float32)
    xt = jnp.swapaxes(xr, 1, 2)            # (B, N, C): layout plumbing in XLA
    T = _pick_tile(N)

    kernel = _make_kernel(C, N, T)

    packed = pl.pallas_call(
        kernel,
        out_shape=jax.ShapeDtypeStruct((B, 8, 128), jnp.float32),
        grid_spec=pltpu.PrefetchScalarGridSpec(
            num_scalar_prefetch=0,
            grid=(B,),
            in_specs=[
                pl.BlockSpec((None, C, N), lambda b: (b, 0, 0)),   # (C, N)
                pl.BlockSpec((None, N, C), lambda b: (b, 0, 0)),   # (N, C)
            ],
            out_specs=pl.BlockSpec((None, 8, 128), lambda b: (b, 0, 0)),
            scratch_shapes=[pltpu.VMEM((1, N), jnp.float32)],      # dup counts
        ),
        compiler_params=pltpu.CompilerParams(
            # images are independent -> shard batch across TensorCores (v7x);
            # harmless on single-TC v5e/v6e.
            dimension_semantics=("parallel",)),
    )(xr, xt)

    stats = packed[:, 0, :]                # (B, 128): one stat per lane
    uniq = stats[:, 0].astype(jnp.int32)
    return (uniq, stats[:, 1], stats[:, 2], stats[:, 3], stats[:, 4],
            stats[:, 5])


def _reference(x):
    xf = np.asarray(x, dtype=np.float32)
    B, C, H, W = xf.shape
    xr = xf.reshape(B, C, -1)
    uniq = np.array([np.unique(img, axis=1).shape[1] for img in xr],
                    dtype=np.int32)
    cvar = xr.var(axis=2, ddof=1).mean(axis=1)
    bright = xf.mean(axis=(1, 2, 3))
    white = (xf > 0.9).astype(np.float32).mean(axis=(1, 2, 3))
    dark = (xf < 0.1).astype(np.float32).mean(axis=(1, 2, 3))
    brightp = (xf > 0.8).astype(np.float32).mean(axis=(1, 2, 3))
    return uniq, cvar, bright, white, dark, brightp


if __name__ == "__main__":
    key = jax.random.PRNGKey(0)
    B, C, H, W = 2, 4, 16, 16
    x = jax.random.uniform(key, (B, C, H, W), dtype=jnp.float32)
    # quantize so duplicate pixel colors actually occur (exercises unique path)
    x = jnp.round(x * 4.0) / 4.0

    outs = improved_empty_image_detector(x)
    outs = jax.block_until_ready(outs)

    ref = _reference(x)
    np.testing.assert_array_equal(np.asarray(outs[0]), ref[0])
    for o, r in zip(outs[1:], ref[1:]):
        np.testing.assert_allclose(np.asarray(o), r, rtol=1e-5, atol=1e-6)

    print("KERNEL_OK")
</pallas_src>

<mosaic_0001>
module attributes {stable_mosaic.version = 11 : i64} {
  func.func @kernel(%arg0: i32, %arg1: memref<1x4x256xf32, #tpu.memory_space<vmem>>, %arg2: memref<1x256x4xf32, #tpu.memory_space<vmem>>, %arg3: memref<1x8x128xf32, #tpu.memory_space<vmem>>, %arg4: memref<1x256xf32, #tpu.memory_space<vmem>>) attributes {dimension_semantics = [#tpu.dimension_semantics<parallel>], iteration_bounds = array<i64: 2>, scalar_prefetch = 0 : i64, scratch_operands = 1 : i64, tpu.core_type = #tpu.core_type<tc>, window_params = [{transform_indices = @transform_0, window_bounds = array<i64: 1, 4, 256>}, {transform_indices = @transform_1, window_bounds = array<i64: 1, 256, 4>}, {transform_indices = @transform_2, window_bounds = array<i64: 1, 8, 128>}]} {
    %c0 = arith.constant 0 : index
    %c0_0 = arith.constant 0 : index
    %c0_1 = arith.constant 0 : index
    %0 = vector.load %arg1[%c0, %c0_0, %c0_1] : memref<1x4x256xf32, #tpu.memory_space<vmem>>, vector<1x4x256xf32>
    %1 = vector.shape_cast %0 : vector<1x4x256xf32> to vector<4x256xf32>
    %cst = arith.constant 0.899999976 : f32
    %2 = vector.broadcast %cst : f32 to vector<4x256xf32>
    %3 = arith.cmpf ogt, %1, %2 : vector<4x256xf32>
    %4 = arith.extui %3 : vector<4x256xi1> to vector<4x256xi32>
    %5 = arith.sitofp %4 : vector<4x256xi32> to vector<4x256xf32>
    %6 = vector.shape_cast %5 : vector<4x256xf32> to vector<1x4x256xf32>
    %cst_2 = arith.constant dense<0.000000e+00> : vector<1xf32>
    %7 = vector.multi_reduction <add>, %6, %cst_2 [1, 2] : vector<1x4x256xf32> to vector<1xf32>
    %8 = vector.shape_cast %7 : vector<1xf32> to vector<1x1x1xf32>
    %9 = vector.extract %8[0, 0, 0] : f32 from vector<1x1x1xf32>
    %cst_3 = arith.constant 9.765625E-4 : f32
    %10 = arith.mulf %9, %cst_3 : f32
    %cst_4 = arith.constant 1.000000e-01 : f32
    %11 = vector.broadcast %cst_4 : f32 to vector<4x256xf32>
    %12 = arith.cmpf olt, %1, %11 : vector<4x256xf32>
    %13 = arith.extui %12 : vector<4x256xi1> to vector<4x256xi32>
    %14 = arith.sitofp %13 : vector<4x256xi32> to vector<4x256xf32>
    %15 = vector.shape_cast %14 : vector<4x256xf32> to vector<1x4x256xf32>
    %cst_5 = arith.constant dense<0.000000e+00> : vector<1xf32>
    %16 = vector.multi_reduction <add>, %15, %cst_5 [1, 2] : vector<1x4x256xf32> to vector<1xf32>
    %17 = vector.shape_cast %16 : vector<1xf32> to vector<1x1x1xf32>
    %18 = vector.extract %17[0, 0, 0] : f32 from vector<1x1x1xf32>
    %cst_6 = arith.constant 9.765625E-4 : f32
    %19 = arith.mulf %18, %cst_6 : f32
    %cst_7 = arith.constant 8.000000e-01 : f32
    %20 = vector.broadcast %cst_7 : f32 to vector<4x256xf32>
    %21 = arith.cmpf ogt, %1, %20 : vector<4x256xf32>
    %22 = arith.extui %21 : vector<4x256xi1> to vector<4x256xi32>
    %23 = arith.sitofp %22 : vector<4x256xi32> to vector<4x256xf32>
    %24 = vector.shape_cast %23 : vector<4x256xf32> to vector<1x4x256xf32>
    %cst_8 = arith.constant dense<0.000000e+00> : vector<1xf32>
    %25 = vector.multi_reduction <add>, %24, %cst_8 [1, 2] : vector<1x4x256xf32> to vector<1xf32>
    %26 = vector.shape_cast %25 : vector<1xf32> to vector<1x1x1xf32>
    %27 = vector.extract %26[0, 0, 0] : f32 from vector<1x1x1xf32>
    %cst_9 = arith.constant 9.765625E-4 : f32
    %28 = arith.mulf %27, %cst_9 : f32
    %cst_10 = arith.constant dense<0.000000e+00> : vector<4xf32>
    %29 = vector.multi_reduction <add>, %1, %cst_10 [1] : vector<4x256xf32> to vector<4xf32>
    %30 = vector.shape_cast %29 : vector<4xf32> to vector<4x1xf32>
    %31 = vector.shape_cast %30 : vector<4x1xf32> to vector<1x4x1xf32>
    %cst_11 = arith.constant dense<0.000000e+00> : vector<1xf32>
    %32 = vector.multi_reduction <add>, %31, %cst_11 [1, 2] : vector<1x4x1xf32> to vector<1xf32>
    %33 = vector.shape_cast %32 : vector<1xf32> to vector<1x1x1xf32>
    %34 = vector.extract %33[0, 0, 0] : f32 from vector<1x1x1xf32>
    %cst_12 = arith.constant 9.765625E-4 : f32
    %35 = arith.mulf %34, %cst_12 : f32
    %cst_13 = arith.constant 3.906250e-03 : f32
    %36 = vector.broadcast %cst_13 : f32 to vector<4x1xf32>
    %37 = arith.mulf %30, %36 : vector<4x1xf32>
    %38 = vector.broadcast %37 : vector<4x1xf32> to vector<4x256xf32>
    %39 = arith.subf %1, %38 : vector<4x256xf32>
    %40 = arith.mulf %39, %39 : vector<4x256xf32>
    %cst_14 = arith.constant dense<0.000000e+00> : vector<4xf32>
    %41 = vector.multi_reduction <add>, %40, %cst_14 [1] : vector<4x256xf32> to vector<4xf32>
    %42 = vector.shape_cast %41 : vector<4xf32> to vector<4x1xf32>
    %cst_15 = arith.constant 0.00392156886 : f32
    %43 = vector.broadcast %cst_15 : f32 to vector<4x1xf32>
    %44 = arith.mulf %42, %43 : vector<4x1xf32>
    %45 = vector.shape_cast %44 : vector<4x1xf32> to vector<1x4x1xf32>
    %cst_16 = arith.constant dense<0.000000e+00> : vector<1xf32>
    %46 = vector.multi_reduction <add>, %45, %cst_16 [1, 2] : vector<1x4x1xf32> to vector<1xf32>
    %47 = vector.shape_cast %46 : vector<1xf32> to vector<1x1x1xf32>
    %48 = vector.extract %47[0, 0, 0] : f32 from vector<1x1x1xf32>
    %cst_17 = arith.constant 2.500000e-01 : f32
    %49 = arith.mulf %48, %cst_17 : f32
    %cst_18 = arith.constant 0.000000e+00 : f32
    %50 = vector.broadcast %cst_18 : f32 to vector<1x256xf32>
    %c0_19 = arith.constant 0 : index
    %c0_20 = arith.constant 0 : index
    %51 = vector.load %arg4[%c0_19, %c0_20] : memref<1x256xf32, #tpu.memory_space<vmem>>, vector<1x256xf32>
    tpu.vector_store %arg4[%c0_19, %c0_20], %50 {strides = array<i32>} : memref<1x256xf32, #tpu.memory_space<vmem>>, vector<1x256xf32>,
    %52 = tpu.iota {dimensions = array<i32: 0>} : vector<256x256xi32>
    %53 = tpu.iota {dimensions = array<i32: 1>} : vector<256x256xi32>
    %54 = arith.cmpi slt, %52, %53 : vector<256x256xi32>
    %c0_i32 = arith.constant 0 : i32
    %c1_i32 = arith.constant 1 : i32
    %55 = arith.muli %c0_i32, %c1_i32 : i32
    %c0_i32_21 = arith.constant 0 : i32
    %56 = arith.addi %c0_i32_21, %55 : i32
    %c256_i32 = arith.constant 256 : i32
    %57 = arith.muli %56, %c256_i32 : i32
    %58 = tpu.assume_multiple %57, 256 : i32
    %c0_22 = arith.constant 0 : index
    %59 = arith.index_cast %58 : i32 to index
    %c0_23 = arith.constant 0 : index
    %60 = vector.load %arg2[%c0_22, %59, %c0_23] : memref<1x256x4xf32, #tpu.memory_space<vmem>>, vector<1x256x4xf32>
    %61 = vector.shape_cast %60 : vector<1x256x4xf32> to vector<256x4xf32>
    %c0_i32_24 = arith.constant 0 : i32
    %c1_i32_25 = arith.constant 1 : i32
    %62 = arith.muli %c0_i32_24, %c1_i32_25 : i32
    %c0_i32_26 = arith.constant 0 : i32
    %63 = arith.addi %c0_i32_26, %62 : i32
    %64 = arith.cmpi sge, %63, %56 : i32
    %65 = arith.extui %64 : i1 to i32
    %c0_i32_27 = arith.constant 0 : i32
    %66 = arith.cmpi ne, %65, %c0_i32_27 : i32
    scf.if %66 {
      %c256_i32_40 = arith.constant 256 : i32
      %105 = arith.muli %63, %c256_i32_40 : i32
      %106 = tpu.assume_multiple %105, 256 : i32
      %c0_41 = arith.constant 0 : index
      %c0_42 = arith.constant 0 : index
      %107 = arith.index_cast %106 : i32 to index
      %108 = vector.load %arg1[%c0_41, %c0_42, %107] : memref<1x4x256xf32, #tpu.memory_space<vmem>>, vector<1x4x256xf32>
      %109 = vector.shape_cast %108 : vector<1x4x256xf32> to vector<4x256xf32>
      %110 = vector.extract_strided_slice %61 {offsets = [0, 0], sizes = [256, 1], strides = [1, 1]} : vector<256x4xf32> to vector<256x1xf32>
      %111 = vector.extract_strided_slice %109 {offsets = [0, 0], sizes = [1, 256], strides = [1, 1]} : vector<4x256xf32> to vector<1x256xf32>
      %112 = vector.broadcast %110 : vector<256x1xf32> to vector<256x256xf32>
      %113 = vector.broadcast %111 : vector<1x256xf32> to vector<256x256xf32>
      %114 = arith.cmpf oeq, %112, %113 : vector<256x256xf32>
      %115 = vector.extract_strided_slice %61 {offsets = [0, 1], sizes = [256, 1], strides = [1, 1]} : vector<256x4xf32> to vector<256x1xf32>
      %116 = vector.extract_strided_slice %109 {offsets = [1, 0], sizes = [1, 256], strides = [1, 1]} : vector<4x256xf32> to vector<1x256xf32>
      %117 = vector.broadcast %115 : vector<256x1xf32> to vector<256x256xf32>
      %118 = vector.broadcast %116 : vector<1x256xf32> to vector<256x256xf32>
      %119 = arith.cmpf oeq, %117, %118 : vector<256x256xf32>
      %120 = arith.andi %114, %119 : vector<256x256xi1>
      %121 = vector.extract_strided_slice %61 {offsets = [0, 2], sizes = [256, 1], strides = [1, 1]} : vector<256x4xf32> to vector<256x1xf32>
      %122 = vector.extract_strided_slice %109 {offsets = [2, 0], sizes = [1, 256], strides = [1, 1]} : vector<4x256xf32> to vector<1x256xf32>
      %123 = vector.broadcast %121 : vector<256x1xf32> to vector<256x256xf32>
      %124 = vector.broadcast %122 : vector<1x256xf32> to vector<256x256xf32>
      %125 = arith.cmpf oeq, %123, %124 : vector<256x256xf32>
      %126 = arith.andi %120, %125 : vector<256x256xi1>
      %127 = vector.extract_strided_slice %61 {offsets = [0, 3], sizes = [256, 1], strides = [1, 1]} : vector<256x4xf32> to vector<256x1xf32>
      %128 = vector.extract_strided_slice %109 {offsets = [3, 0], sizes = [1, 256], strides = [1, 1]} : vector<4x256xf32> to vector<1x256xf32>
      %129 = vector.broadcast %127 : vector<256x1xf32> to vector<256x256xf32>
      %130 = vector.broadcast %128 : vector<1x256xf32> to vector<256x256xf32>
      %131 = arith.cmpf oeq, %129, %130 : vector<256x256xf32>
      %132 = arith.andi %126, %131 : vector<256x256xi1>
      %133 = arith.cmpi slt, %56, %63 : i32
      %134 = vector.broadcast %133 : i1 to vector<256x256xi1>
      %135 = arith.ori %134, %54 : vector<256x256xi1>
      %136 = arith.andi %132, %135 : vector<256x256xi1>
      %cst_43 = arith.constant 1.000000e+00 : f32
      %cst_44 = arith.constant 0.000000e+00 : f32
      %137 = vector.broadcast %cst_43 : f32 to vector<256x256xf32>
      %138 = vector.broadcast %cst_44 : f32 to vector<256x256xf32>
      %139 = arith.select %136, %137, %138 : vector<256x256xi1>, vector<256x256xf32>
      %c0_45 = arith.constant 0 : index
      %140 = arith.index_cast %106 : i32 to index
      %141 = vector.load %arg4[%c0_45, %140] : memref<1x256xf32, #tpu.memory_space<vmem>>, vector<1x256xf32>
      %cst_46 = arith.constant dense<0.000000e+00> : vector<256xf32>
      %142 = vector.multi_reduction <add>, %139, %cst_46 [0] : vector<256x256xf32> to vector<256xf32>
      %143 = vector.shape_cast %142 : vector<256xf32> to vector<1x256xf32>
      %144 = arith.addf %141, %143 : vector<1x256xf32>
      %c0_47 = arith.constant 0 : index
      %145 = arith.index_cast %106 : i32 to index
      %146 = vector.load %arg4[%c0_47, %145] : memref<1x256xf32, #tpu.memory_space<vmem>>, vector<1x256xf32>
      tpu.vector_store %arg4[%c0_47, %145], %144 {strides = array<i32>} : memref<1x256xf32, #tpu.memory_space<vmem>>, vector<1x256xf32>,
    } else {
    }
    %c1_i32_28 = arith.constant 1 : i32
    %c1_i32_29 = arith.constant 1 : i32
    %c0_30 = arith.constant 0 : index
    %c0_31 = arith.constant 0 : index
    %67 = vector.load %arg4[%c0_30, %c0_31] : memref<1x256xf32, #tpu.memory_space<vmem>>, vector<1x256xf32>
    %cst_32 = arith.constant 0.000000e+00 : f32
    %68 = vector.broadcast %cst_32 : f32 to vector<1x256xf32>
    %69 = arith.cmpf oeq, %67, %68 : vector<1x256xf32>
    %70 = arith.extui %69 : vector<1x256xi1> to vector<1x256xi32>
    %71 = arith.sitofp %70 : vector<1x256xi32> to vector<1x256xf32>
    %72 = vector.shape_cast %71 : vector<1x256xf32> to vector<1x1x256xf32>
    %cst_33 = arith.constant dense<0.000000e+00> : vector<1xf32>
    %73 = vector.multi_reduction <add>, %72, %cst_33 [1, 2] : vector<1x1x256xf32> to vector<1xf32>
    %74 = vector.shape_cast %73 : vector<1xf32> to vector<1x1x1xf32>
    %75 = vector.extract %74[0, 0, 0] : f32 from vector<1x1x1xf32>
    %76 = tpu.iota {dimensions = array<i32: 1>} : vector<8x128xi32>
    %c0_i32_34 = arith.constant 0 : i32
    %77 = vector.broadcast %c0_i32_34 : i32 to vector<8x128xi32>
    %78 = arith.cmpi eq, %76, %77 : vector<8x128xi32>
    %cst_35 = arith.constant 0.000000e+00 : f32
    %79 = vector.broadcast %75 : f32 to vector<8x128xf32>
    %80 = vector.broadcast %cst_35 : f32 to vector<8x128xf32>
    %81 = arith.select %78, %79, %80 : vector<8x128xi1>, vector<8x128xf32>
    %c1_i32_36 = arith.constant 1 : i32
    %82 = vector.broadcast %c1_i32_36 : i32 to vector<8x128xi32>
    %83 = arith.cmpi eq, %76, %82 : vector<8x128xi32>
    %84 = vector.broadcast %49 : f32 to vector<8x128xf32>
    %85 = arith.select %83, %84, %81 : vector<8x128xi1>, vector<8x128xf32>
    %c2_i32 = arith.constant 2 : i32
    %86 = vector.broadcast %c2_i32 : i32 to vector<8x128xi32>
    %87 = arith.cmpi eq, %76, %86 : vector<8x128xi32>
    %88 = vector.broadcast %35 : f32 to vector<8x128xf32>
    %89 = arith.select %87, %88, %85 : vector<8x128xi1>, vector<8x128xf32>
    %c3_i32 = arith.constant 3 : i32
    %90 = vector.broadcast %c3_i32 : i32 to vector<8x128xi32>
    %91 = arith.cmpi eq, %76, %90 : vector<8x128xi32>
    %92 = vector.broadcast %10 : f32 to vector<8x128xf32>
    %93 = arith.select %91, %92, %89 : vector<8x128xi1>, vector<8x128xf32>
    %c4_i32 = arith.constant 4 : i32
    %94 = vector.broadcast %c4_i32 : i32 to vector<8x128xi32>
    %95 = arith.cmpi eq, %76, %94 : vector<8x128xi32>
    %96 = vector.broadcast %19 : f32 to vector<8x128xf32>
    %97 = arith.select %95, %96, %93 : vector<8x128xi1>, vector<8x128xf32>
    %c5_i32 = arith.constant 5 : i32
    %98 = vector.broadcast %c5_i32 : i32 to vector<8x128xi32>
    %99 = arith.cmpi eq, %76, %98 : vector<8x128xi32>
    %100 = vector.broadcast %28 : f32 to vector<8x128xf32>
    %101 = arith.select %99, %100, %97 : vector<8x128xi1>, vector<8x128xf32>
    %c0_37 = arith.constant 0 : index
    %c0_38 = arith.constant 0 : index
    %c0_39 = arith.constant 0 : index
    %102 = vector.load %arg3[%c0_37, %c0_38, %c0_39] : memref<1x8x128xf32, #tpu.memory_space<vmem>>, vector<1x8x128xf32>
    %103 = vector.shape_cast %102 : vector<1x8x128xf32> to vector<8x128xf32>
    %104 = vector.shape_cast %101 : vector<8x128xf32> to vector<1x8x128xf32>
    tpu.vector_store %arg3[%c0_37, %c0_38, %c0_39], %104 {strides = array<i32>} : memref<1x8x128xf32, #tpu.memory_space<vmem>>, vector<1x8x128xf32>,
    return
  }
  func.func @transform_0(%arg0: i32) -> (i32, i32, i32) {
    %c0_i32 = arith.constant 0 : i32
    %c0_i32_0 = arith.constant 0 : i32
    %c0_i32_1 = arith.constant 0 : i32
    return %arg0, %c0_i32, %c0_i32_0 : i32, i32, i32
  }
  func.func @transform_1(%arg0: i32) -> (i32, i32, i32) {
    %c0_i32 = arith.constant 0 : i32
    %c0_i32_0 = arith.constant 0 : i32
    %c0_i32_1 = arith.constant 0 : i32
    return %arg0, %c0_i32, %c0_i32_0 : i32, i32, i32
  }
  func.func @transform_2(%arg0: i32) -> (i32, i32, i32) {
    %c0_i32 = arith.constant 0 : i32
    %c0_i32_0 = arith.constant 0 : i32
    %c0_i32_1 = arith.constant 0 : i32
    return %arg0, %c0_i32, %c0_i32_0 : i32, i32, i32
  }
}

</mosaic_0001>

<bundles_post_ra>
// kernel: tpu_custom_call.1
= control target key start
LH: loop header
LB: loop body
LE: loop exit
PB: predicated region body
PF: predicated region fallthrough
CT: control target
= control target key end

     0   :  { %7 = vsyncpa [#allocation4], 0  ;;  %s3603_s0 = inlined_call_operand.vmem [shape: f32[2,4,256], index: 0, kind: input, shape index: {}]   ;;  %s3604_s1 = inlined_call_operand.vmem [shape: f32[2,256,4], index: 1, kind: input, shape index: {}]   ;;  %s3605_s2 = inlined_call_operand.hbm [shape: f32[2,8,128], index: 2, kind: output, shape index: {}]  }
   0x1   :  { %9 = vsyncpa [#allocation4 + $0x1], 0  ;;  %s2040_s9 = smov 0   ;;  %s2042_s10 = smov 0  }
   0x2   :  { %s2044_s11 = smov 0   ;;  %s2046_s12 = smov 0  }
   0x3 LB: > { %s2061_s13 = sadd.s32 4294967295, %s2015_s12   ;;  %s1831_s14 = sadd.s32 4294967294, %s2015_s12   ;;  %s2015_s12 = sphi %s2046_s12, %s3881_s12   ;;  %s2011_s11 = sphi %s2044_s11, %s3880_s11   ;;  %s2007_s10 = sphi %s2042_s10, %s3879_s10   ;;  %s2003_s9 = sphi %s2040_s9, %s3878_s9  }
   0x4   : > { %s2065_s15 = sadd.s32 1, %s2015_s12   ;;  %s74_s16 = sadd.s32 1, %s2011_s11 }
   0x5   : > { %s71_s17 = ssub.s32 %s2015_s12, %s2065_s15  ;;  %p84_p0 = scmp.ne.s32.totalorder %s2011_s11, %s2007_s10 }
   0x6   : > { %p72_p1 = scmp.eq.s32.totalorder %s71_s17, 0  ;;  %p85_p2 = scmp.eq.s32.totalorder %s2061_s13, 1 }
   0x7   : > { %p90_p3 = scmp.ne.s32.totalorder %s2007_s10, %s2003_s9  ;;  %p91_p4 = scmp.eq.s32.totalorder %s1831_s14, 1 }
   0x8   : > { %s2076_s18 = scalar_select %p72_p1, %s2011_s11, %s74_s16  }
   0x9   : > { %p2078_p5 = por %p85_p2, %p84_p0  ;;  %p2082_p6 = por %p91_p4, %p90_p3 }
   0xa   : > { %p1834_p7 = scmp.ge.s32.totalorder %s2015_s12, 1  ;;  %p125_p8 = scmp.lt.s32.totalorder %s2015_s12, 3 }
   0xc   : > { %p126_p9 = pnand %p1834_p7, %p125_p8 }
   0xe   : > { %129 = sbr.rel (%p126_p9) target bundleno = 846 (0x34e), region = 28 }
  0x15   : > { %p152_p10 = scmp.lt.s32.totalorder %s2061_s13, 1  ;;  %v2017_v0 = vmov 0   ;;  %vm169_vm0 = vcmask 1043456   ;;  %v3606_v4 = vmov 0.0   ;;  %v3612_v49 = vmov 3   ;;  %s149_s6 = sand.u32 1, %s2007_s10  }
  0x16   : > { %1908 = vset.pattern.permute.xlu1 %v2017_v0  ;;  %1909 = vset.pattern.permute.xlu0 %v2017_v0  ;;  %v3610_v55 = vmov 1   ;;  %vm229_vm4 = vcmask 3072   ;;  %s3545_s14 = sshll.u32 %s149_s6, 3  ;;  %s1845_s24 = sshll.u32 %s2061_s13, 7 }
  0x17   : > { %s2090_s21 = scalar_select %p152_p10, %s2061_s13, 1 }
  0x18   : > { %s1747_s13 = scalar_lea.sflag [#allocation4], %s149_s6 }
  0x19   : > { %s1848_s22 = sshll.u32 %s2090_s21, 3  ;;  %s1849_s26 = sshll.u32 %s2090_s21, 8 }
  0x1a   : > { %s156_s25 = scalar_lea.vmem %s3603_s0, %s1848_s22  ;;  %s2119_s29 = scalar_lea.vmem %s3604_s1, %s1849_s26 }
  0x1b   : > { %v2096_v1 = vld [vmem:[%s156_s25] sm:$0xff]  ;;  %v2126_v23 = vld [vmem:[%s2119_s29 + $0x10] sm:$0xff]  ;;  %v2130_v24 = vld [vmem:[%s2119_s29 + $0x8] sm:$0xff]  ;;  %s151_s25 = scalar_lea.vmem [#allocation3], %s3545_s14 }
  0x1c   : > { %v222_v2 = vcombine.high %v2096_v1, %v2096_v1  ;;  %v224_v3 = vsel %vm169_vm0, %v2096_v1, 0.0  ;;  %vm163_vm1 = vcmp.gt.f32.partialorder %v2096_v1, 0.9  ;;  %vm202_vm2 = vcmp.gt.f32.partialorder %v2096_v1, 0.8  ;;  %v2122_v22 = vld [vmem:[%s2119_s29] sm:$0xff] }
  0x1d   : > { %v1840_v5 = vsel %vm163_vm1, 1.0, %v3606_v4  ;;  %v1842_v6 = vsel %vm202_vm2, 1.0, %v3606_v4  ;;  %vm183_vm3 = vcmp.lt.f32.partialorder %v2096_v1, 0.1  ;;  %v2133_v25 = vld [vmem:[%s2119_s29 + $0x18] sm:$0xff]  ;;  %v2138_v26 = vld [vmem:[%s2119_s29 + $0x50] sm:$0xff] }
  0x1e   : > { %v225_v7 = vsel %vm169_vm0, %v222_v2, 0.0  ;;  %v167_v8 = vcombine.high %v1840_v5, %v1840_v5  ;;  %v170_v9 = vsel %vm169_vm0, %v1840_v5, 0.0  ;;  %v206_v10 = vcombine.high %v1842_v6, %v1842_v6  ;;  %v2141_v27 = vld [vmem:[%s2119_s29 + $0x20] sm:$0xff]  ;;  %v2149_v29 = vld [vmem:[%s2119_s29 + $0x28] sm:$0xff]  ;;  %v2154_v30 = vld [vmem:[%s2119_s29 + $0x70] sm:$0xff]  ;;  %s1760_s26 = sshll.u32 %s151_s25, 4  ;;  %s3561_s26 = int_to_ptr.vmem [resolvable:$true] %s1760_s26 }
  0x1f   : > { %v226_v11 = vadd.f32 %v225_v7, %v224_v3  ;;  %v208_v12 = vsel %vm169_vm0, %v1842_v6, 0.0  ;;  %v1841_v13 = vsel %vm183_vm3, 1.0, %v3606_v4  ;;  %v2146_v28 = vld [vmem:[%s2119_s29 + $0x60] sm:$0xff]  ;;  %v2157_v31 = vld [vmem:[%s2119_s29 + $0x30] sm:$0xff]  ;;  %v2165_v33 = vld [vmem:[%s2119_s29 + $0x38] sm:$0xff]  ;;  %v3614_v7 = vmov 2  }
  0x20   : > { %v171_v14 = vsel %vm169_vm0, %v167_v8, 0.0  ;;  %v209_v15 = vsel %vm169_vm0, %v206_v10, 0.0  ;;  %v187_v16 = vcombine.high %v1841_v13, %v1841_v13  ;;  %v189_v17 = vsel %vm169_vm0, %v1841_v13, 0.0  ;;  %v2162_v32 = vld [vmem:[%s2119_s29 + $0x80] sm:$0xff]  ;;  %v2170_v34 = vld [vmem:[%s2119_s29 + $0x90] sm:$0xff]  ;;  %v2181_v37 = vld [vmem:[%s2119_s29 + $0x48] sm:$0xff] }
  0x21   : > { %227 = vadd.xlane.f32.xlu1 %v226_v11  ;;  %v172_v18 = vadd.f32 %v171_v14, %v170_v9  ;;  %v210_v19 = vadd.f32 %v209_v15, %v208_v12  ;;  %v2173_v35 = vld [vmem:[%s2119_s29 + $0x40] sm:$0xff]  ;;  %v2186_v38 = vld [vmem:[%s2119_s29 + $0xb0] sm:$0xff]  ;;  %v2189_v39 = vld [vmem:[%s2119_s29 + $0x58] sm:$0xff] }
  0x22   : > { %v190_v20 = vsel %vm169_vm0, %v187_v16, 0.0  ;;  %v2178_v36 = vld [vmem:[%s2119_s29 + $0xa0] sm:$0xff]  ;;  %v2197_v41 = vld [vmem:[%s2119_s29 + $0x68] sm:$0xff]  ;;  %v2202_v42 = vld [vmem:[%s2119_s29 + $0xd0] sm:$0xff] }
  0x23   : > { %173 = vadd.xlane.f32.xlu0 %v172_v18  ;;  %v191_v21 = vadd.f32 %v190_v20, %v189_v17  ;;  %v2194_v40 = vld [vmem:[%s2119_s29 + $0xc0] sm:$0xff]  ;;  %v2205_v43 = vld [vmem:[%s2119_s29 + $0x78] sm:$0xff]  ;;  %v2213_v45 = vld [vmem:[%s2119_s29 + $0x88] sm:$0xff] }
  0x24   : > { %v2210_v44 = vld [vmem:[%s2119_s29 + $0xe0] sm:$0xff]  ;;  %v2218_v46 = vld [vmem:[%s2119_s29 + $0xf0] sm:$0xff]  ;;  %v2221_v47 = vld [vmem:[%s2119_s29 + $0x98] sm:$0xff] }
  0x25   : > { %211 = vadd.xlane.f32.xlu1 %v210_v19  ;;  %v2226_v48 = vld [vmem:[%s2119_s29 + $0xa8] sm:$0xff]  ;;  %v2232_v50 = vld [vmem:[%s2119_s29 + $0xb8] sm:$0xff] }
  0x26   : > { %v2236_v51 = vld [vmem:[%s2119_s29 + $0xc8] sm:$0xff]  ;;  %v2240_v52 = vld [vmem:[%s2119_s29 + $0xd8] sm:$0xff] }
  0x27   : > { %192 = vadd.xlane.f32.xlu0 %v191_v21  ;;  %v2244_v53 = vld [vmem:[%s2119_s29 + $0xe8] sm:$0xff]  ;;  %v409_v54 = vld [vmem:[%s2119_s29 + $0xf8] sm:$0xff] }
  0x36   : > { %413 = vperm.xlu1 %1908, %v2122_v22  }
  0x3a   : > { %423 = vperm.xlu1 %1908, %v2126_v23  }
  0x3d   : > { %418 = vperm.xlu0 %1909, %v2130_v24  }
  0x3e   : > { %428 = vperm.xlu1 %1908, %v2133_v25  }
  0x41   : > { %463 = vperm.xlu0 %1909, %v2138_v26  }
  0x42   : > { %433 = vperm.xlu1 %1908, %v2141_v27  }
  0x45   : > { %473 = vperm.xlu0 %1909, %v2146_v28  }
  0x46   : > { %438 = vperm.xlu1 %1908, %v2149_v29  }
  0x49   : > { %483 = vperm.xlu0 %1909, %v2154_v30  }
  0x4a   : > { %443 = vperm.xlu1 %1908, %v2157_v31  }
  0x4d   : > { %493 = vperm.xlu0 %1909, %v2162_v32  }
  0x4e   : > { %448 = vperm.xlu1 %1908, %v2165_v33  }
  0x51   : > { %503 = vperm.xlu0 %1909, %v2170_v34  }
  0x52   : > { %453 = vperm.xlu1 %1908, %v2173_v35  }
  0x55   : > { %513 = vperm.xlu0 %1909, %v2178_v36  }
  0x56   : > { %458 = vperm.xlu1 %1908, %v2181_v37  }
  0x59   : > { %523 = vperm.xlu0 %1909, %v2186_v38  }
  0x5a   : > { %468 = vperm.xlu1 %1908, %v2189_v39  }
  0x5d   : > { %533 = vperm.xlu0 %1909, %v2194_v40  }
  0x5e   : > { %478 = vperm.xlu1 %1908, %v2197_v41  }
  0x61   : > { %543 = vperm.xlu0 %1909, %v2202_v42  }
  0x62   : > { %488 = vperm.xlu1 %1908, %v2205_v43  }
  0x65   : > { %553 = vperm.xlu0 %1909, %v2210_v44  }
  0x66   : > { %498 = vperm.xlu1 %1908, %v2213_v45  }
  0x69   : > { %563 = vperm.xlu0 %1909, %v2218_v46  }
  0x6a   : > { %508 = vperm.xlu1 %1908, %v2221_v47  }
  0x6d   : > { %1913 = vset.pattern.permute.xlu0 %v3612_v49 }
  0x6e   : > { %518 = vperm.xlu1 %1908, %v2226_v48   ;;  %1207 = vperm.xlu0 %1913, %v2130_v24  }
  0x72   : > { %528 = vperm.xlu1 %1908, %v2232_v50  }
  0x76   : > { %538 = vperm.xlu1 %1908, %v2236_v51  }
  0x7a   : > { %548 = vperm.xlu1 %1908, %v2240_v52  }
  0x7e   : > { %558 = vperm.xlu1 %1908, %v2244_v53  }
  0x82   : > { %568 = vperm.xlu1 %1908, %v409_v54   ;;  %v2022_v54 = vmov 839922192  }
  0x86   : > { %1910 = vset.pattern.permute.xlu1 %v3610_v55 }
  0x87   : > { %659 = vperm.xlu1 %1910, %v2130_v24  }
  0x8b   : > { %663 = vperm.xlu1 %1910, %v2126_v23  }
  0x8f   : > { %671 = vperm.xlu1 %1910, %v2141_v27  }
  0x93   : > { %679 = vperm.xlu1 %1910, %v2157_v31  }
  0x97   : > { %687 = vperm.xlu1 %1910, %v2173_v35  }
  0x9b   : > { %695 = vperm.xlu1 %1910, %v2138_v26  }
  0x9f   : > { %703 = vperm.xlu1 %1910, %v2146_v28  }
  0xa3   : > { %711 = vperm.xlu1 %1910, %v2154_v30  }
  0xa7   : > { %719 = vperm.xlu1 %1910, %v2162_v32  }
  0xab   : > { %727 = vperm.xlu1 %1910, %v2170_v34  }
  0xae   : > { %v228_v56 = vpop.xlane.xlu1 %227 }
  0xaf   : > { %735 = vperm.xlu1 %1910, %v2178_v36   ;;  %v230_v57 = vsel %vm229_vm4, %v228_v56, 0.0 }
  0xb0   : > { %231 = vadd.xlane.f32.xlu0 %v230_v57  ;;  %v174_v58 = vpop.xlane.xlu0 %173  ;;  %v244_v57 = vunpack.c.l.s4 %v2022_v54 }
  0xb1   : > { %v175_v59 = vrot.slane %v174_v58, 4 }
  0xb2   : > { %v212_v60 = vpop.xlane.xlu1 %211 }
  0xb3   : > { %v176_v61 = vadd.f32 %v175_v59, %v174_v58  ;;  %v213_v62 = vrot.slane %v212_v60, 4  ;;  %743 = vperm.xlu1 %1910, %v2186_v38   ;;  %v3608_v58 = vlaneseq }
  0xb4   : > { %v193_v63 = vpop.xlane.xlu0 %192 }
  0xb5   : > { %v214_v0 = vadd.f32 %v213_v62, %v212_v60  ;;  %v194_v2 = vrot.slane %v193_v63, 4  ;;  %v177_v3 = vrot.slane %v176_v61, 2  ;;  %v245_v60 = vunpack.c.0.s8 %v244_v57 }
  0xb6   : > { %v2262_v5 = vpop.permute.xlu1 %413 }
  0xb7   : > { %v195_v6 = vadd.f32 %v194_v2, %v193_v63  ;;  %1911 = vset.pattern.permute.xlu1 %v3614_v7  ;;  %v178_v8 = vadd.f32 %v177_v3, %v176_v61  ;;  %v215_v9 = vrot.slane %v214_v0, 2  ;;  %v2285_v61 = vshrl.u32 %v3608_v58, 7 }
  0xb8   : > { %933 = vperm.xlu1 %1911, %v2130_v24  }
  0xb9   : > { %v179_v10 = vrot.slane %v178_v8, 1  ;;  %v196_v11 = vrot.slane %v195_v6, 2  ;;  %v216_v13 = vadd.f32 %v215_v9, %v214_v0  ;;  %v248_v63 = vsub.s32 %v245_v60, %v2285_v61 }
  0xba   : > { %v2266_v12 = vpop.permute.xlu1 %423  ;;  %v241_v0 = vmul.f32 0.00390625, %v228_v56 }
  0xbb   : > { %v180_v14 = vadd.f32 %v179_v10, %v178_v8  ;;  %v197_v15 = vadd.f32 %v196_v11, %v195_v6  ;;  %v217_v16 = vrot.slane %v216_v13, 1 }
  0xbc   : > { %1912 = vset.pattern.permute.xlu1 %v3612_v49 }
  0xbd   : > { %1203 = vperm.xlu1 %1912, %v2122_v22   ;;  %1850 = vpush %v180_v14  ;;  %v198_v17 = vrot.slane %v197_v15, 1  ;;  %v218_v20 = vadd.f32 %v217_v16, %v216_v13 }
  0xbe   : > { %v2270_v18 = vpop.permute.xlu1 %428 }
  0xbf   : > { %v199_v19 = vadd.f32 %v198_v17, %v197_v15 }
  0xc1   : > { %1914 = vset.pattern.permute.xlu1 %v3614_v7  ;;  %1852 = vpush %v199_v19 }
  0xc2   : > { %1854 = vpush %v218_v20  ;;  %937 = vperm.xlu1 %1914, %v2126_v23   ;;  %v2274_v21 = vpop.permute.xlu1 %433  ;;  %v2319_v20 = vpop.permute.xlu0 %418 }
  0xc6   : > { %1915 = vset.pattern.permute.xlu1 %v3612_v49  ;;  %v2277_v24 = vpop.permute.xlu1 %438  ;;  %1219 = vperm.xlu0 %1913, %v2141_v27   ;;  %v2326_v60 = vpop.permute.xlu0 %463 }
  0xc7   : > { %1211 = vperm.xlu1 %1915, %v2126_v23   ;;  %v249_v23 = vrot.slane %v241_v0, %v248_v63 }
  0xc9   : > { %v251_v8 = vsub.f32 %v2096_v1, %v249_v23 }
  0xca   : > { %v2281_v59 = vpop.permute.xlu1 %443  ;;  %1231 = vperm.xlu0 %1913, %v2165_v33   ;;  %v2333_v0 = vpop.permute.xlu0 %473 }
  0xcb   : > { %v252_v56 = vmul.f32 %v251_v8, %v251_v8 }
  0xcd   : > { %v254_v11 = vcombine.high %v252_v56, %v252_v56  ;;  %v256_v15 = vsel %vm169_vm0, %v252_v56, 0.0 }
  0xce   : > { %v2287_v62 = vpop.permute.xlu1 %448  ;;  %1243 = vperm.xlu0 %1913, %v2138_v26   ;;  %v2342_v56 = vpop.permute.xlu0 %483 }
  0xcf   : > { %v257_v14 = vsel %vm169_vm0, %v254_v11, 0.0  ;;  %3639 = vst [vmem:[#allocation16_spill] sm:$0xff] %v2342_v56 }
  0xd0   : > { %v258_v16 = vadd.f32 %v257_v14, %v256_v15 }
  0xd2   : > { %v2291_v2 = vpop.permute.xlu1 %453  ;;  %1255 = vperm.xlu0 %1913, %v2197_v41   ;;  %v2349_v14 = vpop.permute.xlu0 %493 }
  0xd3   : > { %3640 = vst [vmem:[#allocation17_spill] sm:$0xff] %v2349_v14 }
  0xd6   : > { %v2294_v3 = vpop.permute.xlu1 %458  ;;  %1267 = vperm.xlu0 %1913, %v2162_v32  }
  0xda   : > { %v2297_v6 = vpop.permute.xlu1 %468  ;;  %1279 = vperm.xlu0 %1913, %v2221_v47  }
  0xde   : > { %v2301_v9 = vpop.permute.xlu1 %478  ;;  %1303 = vperm.xlu0 %1913, %v2236_v51  }
  0xdf   : > { %3629 = vst [vmem:[#allocation6_spill] sm:$0xff] %v2301_v9 }
  0xe2   : > { %v2304_v10 = vpop.permute.xlu1 %488  ;;  %1307 = vperm.xlu0 %1913, %v2202_v42  }
  0xe3   : > { %3630 = vst [vmem:[#allocation7_spill] sm:$0xff] %v2304_v10 }
  0xe6   : > { %v2307_v13 = vpop.permute.xlu1 %498  ;;  %1939 = vset.pattern.permute.xlu0 %v3610_v55 }
  0xe7   : > { %3631 = vst [vmem:[#allocation8_spill] sm:$0xff] %v2307_v13  ;;  %655 = vperm.xlu0 %1939, %v2122_v22   ;;  %v2413_v13 = vsub.s32 1, %v2285_v61 }
  0xe9   : > { %3651 = vst [vmem:[#allocation26_spill] sm:$0xff] %v2413_v13 }
  0xea   : > { %v2313_v17 = vpop.permute.xlu1 %508 }
  0xeb   : > { %3632 = vst [vmem:[#allocation9_spill] sm:$0xff] %v2313_v17  ;;  %259 = vadd.xlane.f32.xlu1 %v258_v16  ;;  %667 = vperm.xlu0 %1939, %v2133_v25   ;;  %v2359_v16 = vpop.permute.xlu0 %503 }
  0xec   : > { %3641 = vst [vmem:[#allocation18_spill] sm:$0xff] %v2359_v16  ;;  %v1336_v16 = vsub.s32 7, %v2285_v61 }
  0xee   : > { %v2316_v19 = vpop.permute.xlu1 %518  ;;  %s1851_s30 = spop %1850 }
  0xef   : > { %3633 = vst [vmem:[#allocation10_spill] sm:$0xff] %v2316_v19  ;;  %675 = vperm.xlu0 %1939, %v2149_v29   ;;  %v788_v19 = vsub.s32 5, %v2285_v61  ;;  %s182_s8 = smul.f32 0.0009765625, %s1851_s30  ;;  %s1953_s30 = scalar_lea.vmem %s3561_s26, 128 }
  0xf0   : > { %p1954_p11 = scmp.ne.s32.totalorder %s3561_s26, %s1953_s30 }
  0xf2   : > { %v2321_v54 = vpop.permute.xlu1 %528  ;;  %s1853_s3 = spop %1852  ;;  %p1955_p12 = pnand %p1954_p11, %p2078_p5 }
  0xf3   : > { %3634 = vst [vmem:[#allocation11_spill] sm:$0xff] %v2321_v54  ;;  %683 = vperm.xlu0 %1939, %v2165_v33   ;;  %v578_v54 = vsub.s32 4, %v2285_v61  ;;  %s3540_s4 = spop %1854  ;;  %s201_s22 = smul.f32 0.0009765625, %s1853_s3 }
  0xf4   : > { %s220_s23 = smul.f32 0.0009765625, %s3540_s4  ;;  %p1956_p13 = pneg %p1955_p12 }
  0xf5   : > { %s2024_s3 = smov [#allocation3]  }
  0xf6   : > { %v2324_v57 = vpop.permute.xlu1 %538  ;;  %s1957_s4 = sshll.u32 %s2024_s3, 4  ;;  %s1958_s4 = int_to_ptr.vmem [resolvable:$false] %s1957_s4 }
  0xf7   : > { %3635 = vst [vmem:[#allocation12_spill] sm:$0xff] %v2324_v57  ;;  %691 = vperm.xlu0 %1939, %v2181_v37   ;;  %p1960_p0 = scmp.lt.s32.totalorder %s3561_s26, %s1958_s4 }
  0xfa   : > { %v2329_v63 = vpop.permute.xlu1 %548 }
  0xfb   : > { %3636 = vst [vmem:[#allocation13_spill] sm:$0xff] %v2329_v63  ;;  %699 = vperm.xlu0 %1939, %v2189_v39   ;;  %v3645_v63 = vmov 2  }
  0xfc   : > { %1215 = vperm.xlu1 %1915, %v2133_v25  }
  0xfe   : > { %v2335_v23 = vpop.permute.xlu1 %558 }
  0xff   : > { %3637 = vst [vmem:[#allocation14_spill] sm:$0xff] %v2335_v23  ;;  %707 = vperm.xlu0 %1939, %v2197_v41  }
 0x100   : > { %1916 = vset.pattern.permute.xlu1 %v3614_v7 }
 0x101   : > { %945 = vperm.xlu1 %1916, %v2141_v27  }
 0x102   : > { %v2340_v8 = vpop.permute.xlu1 %568 }
 0x103   : > { %3638 = vst [vmem:[#allocation15_spill] sm:$0xff] %v2340_v8  ;;  %715 = vperm.xlu0 %1939, %v2205_v43   ;;  %v3643_v8 = vmov 3  }
 0x105   : > { %949 = vperm.xlu1 %1916, %v2149_v29  }
 0x106   : > { %v2346_v11 = vpop.permute.xlu1 %659 }
 0x107   : > { %723 = vperm.xlu0 %1939, %v2213_v45  }
 0x109   : > { %1917 = vset.pattern.permute.xlu1 %v3612_v49 }
 0x10a   : > { %1223 = vperm.xlu1 %1917, %v2149_v29   ;;  %v2353_v15 = vpop.permute.xlu1 %663  ;;  %v2367_v29 = vpop.permute.xlu0 %513 }
 0x10b   : > { %731 = vperm.xlu0 %1939, %v2221_v47   ;;  %3642 = vst [vmem:[#allocation19_spill] sm:$0xff] %v2367_v29 }
 0x10e   : > { %1227 = vperm.xlu1 %1917, %v2157_v31   ;;  %v2357_v27 = vpop.permute.xlu1 %671  ;;  %v524_v49 = vpop.permute.xlu0 %523 }
 0x10f   : > { %739 = vperm.xlu0 %1939, %v2226_v48  }
 0x112   : > { %1918 = vset.pattern.permute.xlu1 %v3614_v7  ;;  %v2363_v4 = vpop.permute.xlu1 %679  ;;  %v2382_v7 = vpop.permute.xlu0 %533 }
 0x113   : > { %957 = vperm.xlu1 %1918, %v2165_v33   ;;  %747 = vperm.xlu0 %1939, %v2232_v50  }
 0x116   : > { %v2369_v58 = vpop.permute.xlu1 %687 }
 0x117   : > { %961 = vperm.xlu1 %1918, %v2173_v35   ;;  %751 = vperm.xlu0 %1939, %v2194_v40  }
 0x11a   : > { %v2373_v55 = vpop.permute.xlu1 %695 }
 0x11b   : > { %1919 = vset.pattern.permute.xlu1 %v3643_v8  ;;  %767 = vperm.xlu0 %1939, %v2210_v44  }
 0x11c   : > { %1235 = vperm.xlu1 %1919, %v2173_v35   ;;  %v2392_v35 = vpop.permute.xlu0 %543 }
 0x11d   : > { %3647 = vst [vmem:[#allocation22_spill] sm:$0xff] %v2392_v35  ;;  %v2410_v35 = vsub.s32 0, %v2285_v61 }
 0x11e   : > { %v2378_v33 = vpop.permute.xlu1 %703 }
 0x11f   : > { %771 = vperm.xlu0 %1939, %v2244_v53   ;;  %3650 = vst [vmem:[#allocation25_spill] sm:$0xff] %v2410_v35 }
 0x120   : > { %1239 = vperm.xlu1 %1919, %v2181_v37   ;;  %v2403_v17 = vpop.permute.xlu0 %553 }
 0x122   : > { %v2384_v23 = vpop.permute.xlu1 %711 }
 0x123   : > { %3644 = vst [vmem:[#allocation20_spill] sm:$0xff] %v2384_v23  ;;  %1943 = vset.pattern.permute.xlu0 %v3645_v63 }
 0x124   : > { %1920 = vset.pattern.permute.xlu1 %v3645_v63  ;;  %929 = vperm.xlu0 %1943, %v2122_v22   ;;  %v579_v22 = vrot.slane %v2096_v1, %v578_v54 }
 0x125   : > { %969 = vperm.xlu1 %1920, %v2138_v26   ;;  %v789_v26 = vrot.slane %v2096_v1, %v788_v19 }
 0x126   : > { %v2390_v57 = vpop.permute.xlu1 %719 }
 0x127   : > { %3646 = vst [vmem:[#allocation21_spill] sm:$0xff] %v2390_v57  ;;  %v2420_v19 = vrot.slane %v789_v26, %v2413_v13  ;;  %v1062_v26 = vsub.s32 6, %v2285_v61 }
 0x128   : > { %941 = vperm.xlu0 %1943, %v2133_v25  }
 0x129   : > { %973 = vperm.xlu1 %1920, %v2189_v39   ;;  %vm805_vm9 = vcmp.eq.f32.partialorder %v2353_v15, %v2420_v19 }
 0x12a   : > { %v2398_v29 = vpop.permute.xlu1 %727 }
 0x12b   : > { %3648 = vst [vmem:[#allocation23_spill] sm:$0xff] %v2398_v29  ;;  %v1063_v29 = vrot.slane %v2096_v1, %v1062_v26 }
 0x12c   : > { %953 = vperm.xlu0 %1943, %v2157_v31   ;;  %v2417_v31 = vrot.slane %v579_v22, %v2410_v35 }
 0x12d   : > { %1921 = vset.pattern.permute.xlu1 %v3643_v8 }
 0x12e   : > { %1247 = vperm.xlu1 %1921, %v2189_v39   ;;  %v2407_v25 = vpop.permute.xlu1 %735  ;;  %vm635_vm5 = vcmp.eq.f32.partialorder %v524_v49, %v2417_v31  ;;  %v2424_v39 = vpop.permute.xlu0 %563  ;;  %v1058_v49 = vsub.s32 2, %v2285_v61  ;;  %vm595_vm12 = vcmp.eq.f32.partialorder %v2266_v12, %v2417_v31 }
 0x12f   : > { %3649 = vst [vmem:[#allocation24_spill] sm:$0xff] %v2407_v25  ;;  %3652 = vst [vmem:[#allocation27_spill] sm:$0xff] %v2424_v39  ;;  %v3653_v25 = vmov 0 }
 0x130   : > { %965 = vperm.xlu0 %1943, %v2181_v37   ;;  %vm869_vm15 = vmand %vm595_vm12, %vm805_vm9  ;;  %vm809_vm9 = vcmp.eq.f32.partialorder %v2357_v27, %v2420_v19 }
 0x132   : > { %1251 = vperm.xlu1 %1921, %v2146_v28   ;;  %v744_v54 = vpop.permute.xlu1 %743  ;;  %v2436_v22 = vpop.permute.xlu0 %1207 }
 0x133   : > { %vm845_vm6 = vcmp.eq.f32.partialorder %v744_v54, %v2420_v19  ;;  %v785_v54 = vrot.slane %v2096_v1, %v2413_v13 }
 0x134   : > { %vm2427_vm7 = vmand %vm635_vm5, %vm845_vm6  ;;  %977 = vperm.xlu0 %1943, %v2146_v28   ;;  %v575_v28 = vrot.slane %v2096_v1, %v2410_v35 }
 0x135   : > { %v3654_v25 = vsel %vm2427_vm7, 4294967295, %v3653_v25  ;;  %v2454_v23 = vrot.slane %v785_v54, %v2413_v13  ;;  %v1337_v54 = vrot.slane %v2096_v1, %v1336_v16 }
 0x136   : > { %3655 = vst [vmem:[#allocation28_spill] sm:$0xff] %v3654_v25  ;;  %1922 = vset.pattern.permute.xlu1 %v3645_v63  ;;  %v1332_v25 = vsub.s32 3, %v2285_v61  ;;  %v2458_v56 = vrot.slane %v575_v28, %v2410_v35  ;;  %v2470_v28 = vrot.slane %v1063_v29, %v1058_v49  ;;  %v3658_v29 = vmov 0 }
 0x137   : > { %981 = vperm.xlu1 %1922, %v2197_v41   ;;  %v2434_v37 = vpop.permute.xlu1 %933  ;;  %v1059_v41 = vrot.slane %v2096_v1, %v1058_v49  ;;  %vm804_vm8 = vcmp.eq.f32.partialorder %v2353_v15, %v2454_v23  ;;  %v3676_v35 = vmov 0 }
 0x138   : > { %989 = vperm.xlu0 %1943, %v2205_v43   ;;  %v1333_v26 = vrot.slane %v2096_v1, %v1332_v25  ;;  %vm594_vm10 = vcmp.eq.f32.partialorder %v2266_v12, %v2458_v56 }
 0x139   : > { %v2464_v9 = vrot.slane %v1059_v41, %v1058_v49  ;;  %vm868_vm13 = vmand %vm594_vm10, %vm804_vm8  ;;  %vm808_vm8 = vcmp.eq.f32.partialorder %v2357_v27, %v2454_v23  ;;  %vm598_vm10 = vcmp.eq.f32.partialorder %v2274_v21, %v2458_v56 }
 0x13b   : > { %985 = vperm.xlu1 %1922, %v2154_v30  }
 0x13c   : > { %v2446_v39 = vpop.permute.xlu1 %1203  ;;  %1001 = vperm.xlu0 %1943, %v2170_v34  }
 0x13d   : > { %v232_v14 = vpop.xlane.xlu0 %231 }
 0x13e   : > { %v233_v57 = vrot.slane %v232_v14, 4 }
 0x13f   : > { %1923 = vset.pattern.permute.xlu1 %v3643_v8 }
 0x140   : > { %v234_v10 = vadd.f32 %v233_v57, %v232_v14  ;;  %1259 = vperm.xlu1 %1923, %v2154_v30   ;;  %1013 = vperm.xlu0 %1943, %v2226_v48   ;;  %v2480_v30 = vrot.slane %v1333_v26, %v1332_v25  ;;  %v2482_v14 = vrot.slane %v1337_v54, %v1332_v25 }
 0x141   : > { %v938_v13 = vpop.permute.xlu1 %937 }
 0x142   : > { %v235_v57 = vrot.slane %v234_v10, 2  ;;  %vm1078_vm11 = vcmp.eq.f32.partialorder %v938_v13, %v2464_v9  ;;  %vm1079_vm14 = vcmp.eq.f32.partialorder %v938_v13, %v2470_v28  ;;  %v3656_v13 = vmov 0 }
 0x143   : > { %vm1142_vm0 = vmand %vm868_vm13, %vm1078_vm11 }
 0x144   : > { %1924 = vset.pattern.permute.xlu1 %v3645_v63  ;;  %1025 = vperm.xlu0 %1943, %v2194_v40   ;;  %v236_v1 = vadd.f32 %v235_v57, %v234_v10  ;;  %vm1143_vm1 = vmand %vm869_vm15, %vm1079_vm14 }
 0x145   : > { %993 = vperm.xlu1 %1924, %v2162_v32   ;;  %v2485_v15 = vpop.permute.xlu0 %1219  ;;  %vm872_vm11 = vmand %vm598_vm10, %vm808_vm8 }
 0x146   : > { %v1212_v16 = vpop.permute.xlu1 %1211  ;;  %v237_v12 = vrot.slane %v236_v1, 1 }
 0x147   : > { %vm1352_vm2 = vcmp.eq.f32.partialorder %v1212_v16, %v2480_v30  ;;  %vm1353_vm3 = vcmp.eq.f32.partialorder %v1212_v16, %v2482_v14 }
 0x148   : > { %vm2489_vm5 = vmand %vm1142_vm0, %vm1352_vm2  ;;  %v238_v10 = vadd.f32 %v237_v12, %v236_v1  ;;  %vm1356_vm0 = vcmp.eq.f32.partialorder %v2485_v15, %v2480_v30  ;;  %vm1357_vm2 = vcmp.eq.f32.partialorder %v2485_v15, %v2482_v14 }
 0x149   : > { %v3657_v13 = vsel %vm2489_vm5, 4294967295, %v3656_v13  ;;  %vm2493_vm6 = vmand %vm1143_vm1, %vm1353_vm3  ;;  %1925 = vset.pattern.permute.xlu1 %v3643_v8  ;;  %v2498_v32 = vpop.permute.xlu0 %1231 }
 0x14a   : > { %v3659_v29 = vsel %vm2493_vm6, 4294967295, %v3658_v29  ;;  %1263 = vperm.xlu1 %1925, %v2205_v43   ;;  %1856 = vpush %v238_v10  ;;  %vm1362_vm6 = vcmp.eq.f32.partialorder %v2498_v32, %v2480_v30 }
 0x14d   : > { %v2501_v25 = vpop.permute.xlu0 %1243 }
 0x14e   : > { %1926 = vset.pattern.permute.xlu1 %v3645_v63 }
 0x14f   : > { %997 = vperm.xlu1 %1926, %v2213_v45  }
 0x151   : > { %v2505_v49 = vpop.permute.xlu0 %1255 }
 0x153   : > { %1927 = vset.pattern.permute.xlu1 %v3643_v8 }
 0x154   : > { %1271 = vperm.xlu1 %1927, %v2213_v45  }
 0x155   : > { %v2509_v41 = vpop.permute.xlu0 %1267 }
 0x158   : > { %1275 = vperm.xlu1 %1927, %v2170_v34  }
 0x159   : > { %v2512_v26 = vpop.permute.xlu0 %1279 }
 0x15c   : > { %1928 = vset.pattern.permute.xlu1 %v3645_v63 }
 0x15d   : > { %1005 = vperm.xlu1 %1928, %v2221_v47   ;;  %v2516_v43 = vpop.permute.xlu0 %1303 }
 0x15e   : > { %3660 = vst [vmem:[#allocation29_spill] sm:$0xff] %v2516_v43 }
 0x161   : > { %1009 = vperm.xlu1 %1928, %v2178_v36   ;;  %v2519_v54 = vpop.permute.xlu0 %1307 }
 0x162   : > { %3661 = vst [vmem:[#allocation30_spill] sm:$0xff] %v2519_v54  ;;  %v3690_v54 = vlaneseq }
 0x165   : > { %1929 = vset.pattern.permute.xlu1 %v3643_v8 }
 0x166   : > { %1283 = vperm.xlu1 %1929, %v2178_v36   ;;  %v2523_v45 = vpop.permute.xlu0 %655 }
 0x16a   : > { %1287 = vperm.xlu1 %1929, %v2226_v48   ;;  %v2526_v34 = vpop.permute.xlu0 %667 }
 0x16e   : > { %1930 = vset.pattern.permute.xlu1 %v3645_v63  ;;  %v676_v57 = vpop.permute.xlu0 %675 }
 0x16f   : > { %1017 = vperm.xlu1 %1930, %v2186_v38   ;;  %vm810_vm3 = vcmp.eq.f32.partialorder %v676_v57, %v2454_v23 }
 0x172   : > { %v2530_v47 = vpop.permute.xlu0 %683 }
 0x173   : > { %1931 = vset.pattern.permute.xlu1 %v3643_v8 }
 0x174   : > { %1291 = vperm.xlu1 %1931, %v2186_v38  }
 0x176   : > { %v2534_v1 = vpop.permute.xlu0 %691 }
 0x178   : > { %1932 = vset.pattern.permute.xlu1 %v3645_v63  ;;  %v260_v36 = vpop.xlane.xlu1 %259 }
 0x179   : > { %v261_v16 = vmul.f32 0.003921569, %v260_v36  ;;  %1021 = vperm.xlu1 %1932, %v2232_v50  }
 0x17a   : > { %v2538_v48 = vpop.permute.xlu0 %699 }
 0x17b   : > { %v262_v12 = vsel %vm229_vm4, %v261_v16, 0.0  ;;  %vm599_vm4 = vcmp.eq.f32.partialorder %v2274_v21, %v2417_v31  ;;  %v3662_v16 = vmov 1   ;;  %s1857_s5 = spop %1856 }
 0x17c   : > { %v2541_v10 = vpop.permute.xlu1 %1215  ;;  %263 = vadd.xlane.f32.xlu0 %v262_v12  ;;  %vm873_vm12 = vmand %vm599_vm4, %vm809_vm9  ;;  %vm811_vm9 = vcmp.eq.f32.partialorder %v676_v57, %v2420_v19  ;;  %v3665_v12 = vmov 0  ;;  %vm600_vm4 = vcmp.eq.f32.partialorder %v2277_v24, %v2458_v56  ;;  %s240_s17 = smul.f32 0.0009765625, %s1857_s5  ;;  %s1959_s5 = scalar_lea.vmem %s1958_s4, 256 }
 0x17d   : > { %1933 = vset.pattern.permute.xlu1 %v3643_v8  ;;  %p1961_p1 = scmp.lt.s32.totalorder %s1959_s5, %s1953_s30 }
 0x17e   : > { %1295 = vperm.xlu1 %1933, %v2232_v50   ;;  %v2549_v38 = vpop.permute.xlu0 %707  ;;  %v3663_v50 = vmov 0 }
 0x17f   : > { %p1962_p2 = por %p1961_p1, %p1960_p0 }
 0x180   : > { %v946_v36 = vpop.permute.xlu1 %945 }
 0x181   : > { %vm1082_vm13 = vcmp.eq.f32.partialorder %v946_v36, %v2464_v9  ;;  %vm1083_vm14 = vcmp.eq.f32.partialorder %v946_v36, %v2470_v28  ;;  %p1963_p3 = pnand %p1962_p2, %p1956_p13 }
 0x182   : > { %vm1146_vm15 = vmand %vm872_vm11, %vm1082_vm13  ;;  %1934 = vset.pattern.permute.xlu1 %v3662_v16  ;;  %v2558_v27 = vpop.permute.xlu0 %715 }
 0x183   : > { %vm1147_vm1 = vmand %vm873_vm12, %vm1083_vm14  ;;  %755 = vperm.xlu1 %1934, %v2236_v51   ;;  %vm601_vm12 = vcmp.eq.f32.partialorder %v2277_v24, %v2417_v31  ;;  %v3667_v24 = vmov 0 }
 0x184   : > { %vm2566_vm8 = vmand %vm1146_vm15, %vm1356_vm0  ;;  %v950_v21 = vpop.permute.xlu1 %949 }
 0x185   : > { %v3664_v50 = vsel %vm2566_vm8, 4294967295, %v3663_v50  ;;  %vm2571_vm10 = vmand %vm1147_vm1, %vm1357_vm2  ;;  %vm1084_vm11 = vcmp.eq.f32.partialorder %v950_v21, %v2464_v9  ;;  %vm1085_vm14 = vcmp.eq.f32.partialorder %v950_v21, %v2470_v28 }
 0x186   : > { %v3666_v12 = vsel %vm2571_vm10, 4294967295, %v3665_v12  ;;  %v2578_v36 = vpop.permute.xlu0 %723  ;;  %vm874_vm13 = vmand %vm600_vm4, %vm810_vm3  ;;  %vm592_vm10 = vcmp.eq.f32.partialorder %v2319_v20, %v2458_v56  ;;  %vm802_vm3 = vcmp.eq.f32.partialorder %v2346_v11, %v2454_v23 }
 0x187   : > { %1935 = vset.pattern.permute.xlu1 %v3643_v8  ;;  %vm875_vm15 = vmand %vm601_vm12, %vm811_vm9  ;;  %vm593_vm9 = vcmp.eq.f32.partialorder %v2319_v20, %v2417_v31 }
 0x188   : > { %1299 = vperm.xlu1 %1935, %v2194_v40   ;;  %vm1148_vm0 = vmand %vm874_vm13, %vm1084_vm11  ;;  %vm803_vm11 = vcmp.eq.f32.partialorder %v2346_v11, %v2420_v19  ;;  %v3669_v40 = vmov 0  ;;  %vm816_vm13 = vcmp.eq.f32.partialorder %v2369_v58, %v2454_v23 }
 0x189   : > { %v1224_v15 = vpop.permute.xlu1 %1223  ;;  %vm1149_vm1 = vmand %vm875_vm15, %vm1085_vm14  ;;  %vm1076_vm14 = vcmp.eq.f32.partialorder %v2434_v37, %v2464_v9  ;;  %vm607_vm15 = vcmp.eq.f32.partialorder %v2291_v2, %v2417_v31 }
 0x18a   : > { %vm1358_vm2 = vcmp.eq.f32.partialorder %v1224_v15, %v2480_v30  ;;  %vm1359_vm7 = vcmp.eq.f32.partialorder %v1224_v15, %v2482_v14  ;;  %v2587_v57 = vpop.permute.xlu0 %731 }
 0x18b   : > { %vm2593_vm4 = vmand %vm1148_vm0, %vm1358_vm2 }
 0x18c   : > { %v3668_v24 = vsel %vm2593_vm4, 4294967295, %v3667_v24  ;;  %1936 = vset.pattern.permute.xlu1 %v3662_v16  ;;  %vm2602_vm12 = vmand %vm1149_vm1, %vm1359_vm7  ;;  %vm814_vm7 = vcmp.eq.f32.partialorder %v2530_v47, %v2454_v23  ;;  %vm606_vm1 = vcmp.eq.f32.partialorder %v2291_v2, %v2458_v56  ;;  %vm604_vm4 = vcmp.eq.f32.partialorder %v2287_v62, %v2458_v56 }
 0x18d   : > { %v3670_v40 = vsel %vm2602_vm12, 4294967295, %v3669_v40  ;;  %759 = vperm.xlu1 %1936, %v2202_v42   ;;  %v2607_v21 = vpop.permute.xlu1 %1227  ;;  %vm866_vm0 = vmand %vm592_vm10, %vm802_vm3  ;;  %vm815_vm12 = vcmp.eq.f32.partialorder %v2530_v47, %v2420_v19 }
 0x18e   : > { %v2613_v15 = vpop.permute.xlu0 %739  ;;  %vm2621_vm2 = vmand %vm593_vm9, %vm803_vm11  ;;  %vm605_vm9 = vcmp.eq.f32.partialorder %v2287_v62, %v2417_v31  ;;  %v3684_v62 = vmov 0 }
 0x18f   : > { %3671 = vst [vmem:[#allocation31_spill] sm:$0xff] %v2613_v15  ;;  %vm2631_vm10 = vmand %vm866_vm0, %vm1076_vm14  ;;  %vm3679_vm14 = vcmp.eq.f32.partialorder %v2369_v58, %v2420_v19  ;;  %v3696_v15 = vmov 0 }
 0x190   : > { %vm2636_vm3 = vmand %vm606_vm1, %vm816_vm13 }
 0x191   : > { %1937 = vset.pattern.permute.xlu1 %v3645_v63  ;;  %v3677_v35 = vsel %vm2636_vm3, 4294967295, %v3676_v35  ;;  %vm878_vm11 = vmand %vm604_vm4, %vm814_vm7  ;;  %vm1077_vm7 = vcmp.eq.f32.partialorder %v2434_v37, %v2470_v28  ;;  %vm1350_vm3 = vcmp.eq.f32.partialorder %v2436_v22, %v2480_v30  ;;  %v3713_v37 = vmov 0 }
 0x192   : > { %1033 = vperm.xlu1 %1937, %v2202_v42   ;;  %v958_v47 = vpop.permute.xlu1 %957  ;;  %1029 = vperm.xlu0 %1943, %v2236_v51   ;;  %v2644_v2 = vpop.permute.xlu0 %747  ;;  %vm2649_vm0 = vmand %vm607_vm15, %vm3679_vm14  ;;  %vm1363_vm15 = vcmp.eq.f32.partialorder %v2498_v32, %v2482_v14  ;;  %v3682_v42 = vmov 0  ;;  %v3716_v32 = vmov 0 }
 0x193   : > { %3678 = vst [vmem:[#allocation32_spill] sm:$0xff] %v2644_v2  ;;  %vm879_vm13 = vmand %vm605_vm9, %vm815_vm12  ;;  %vm1088_vm1 = vcmp.eq.f32.partialorder %v958_v47, %v2464_v9  ;;  %vm1089_vm8 = vcmp.eq.f32.partialorder %v958_v47, %v2470_v28  ;;  %v280_v47 = vadd.s32 8, %v2285_v61  ;;  %v2691_v2 = vand.u32 127, %v3690_v54 }
 0x194   : > { %vm1152_vm4 = vmand %vm878_vm11, %vm1088_vm1 }
 0x195   : > { %vm1153_vm5 = vmand %vm879_vm13, %vm1089_vm8 }
 0x196   : > { %vm2663_vm14 = vmand %vm1152_vm4, %vm1362_vm6  ;;  %1938 = vset.pattern.permute.xlu1 %v3662_v16  ;;  %v962_v51 = vpop.permute.xlu1 %961  ;;  %1045 = vperm.xlu0 %1943, %v2244_v53   ;;  %v752_v58 = vpop.permute.xlu0 %751  ;;  %vm647_vm4 = vcmp.eq.f32.partialorder %v2403_v17, %v2417_v31  ;;  %v3702_v17 = vmov 0 }
 0x197   : > { %v3683_v42 = vsel %vm2663_vm14, 4294967295, %v3682_v42  ;;  %vm2669_vm12 = vmand %vm1153_vm5, %vm1363_vm15  ;;  %vm1090_vm8 = vcmp.eq.f32.partialorder %v962_v51, %v2464_v9  ;;  %763 = vperm.xlu1 %1938, %v2240_v52   ;;  %vm1091_vm9 = vcmp.eq.f32.partialorder %v962_v51, %v2470_v28  ;;  %vm849_vm5 = vcmp.eq.f32.partialorder %v752_v58, %v2420_v19 }
 0x198   : > { %v3685_v62 = vsel %vm2669_vm12, 4294967295, %v3684_v62  ;;  %vm2677_vm6 = vmand %vm2621_vm2, %vm1077_vm7  ;;  %vm3691_vm2 = vnez %v3677_v35  ;;  %v281_v51 = vadd.s32 16, %v2285_v61  ;;  %vm3723_vm14 = vcmp.eq.f32.partialorder %v2526_v34, %v2454_v23 }
 0x199   : > { %vm2684_vm11 = vmand %vm2631_vm10, %vm1350_vm3  ;;  %vm639_vm10 = vcmp.eq.f32.partialorder %v2382_v7, %v2417_v31  ;;  %v3699_v7 = vmov 0  ;;  %v286_v58 = vadd.s32 56, %v2285_v61 }
 0x19a   : > { %vm2695_vm13 = vmand %vm3691_vm2, %vm1090_vm8  ;;  %1049 = vperm.xlu0 %1943, %v2218_v46   ;;  %v768_v11 = vpop.permute.xlu0 %767  ;;  %vm318_vm2 = vcmp.lt.s32.totalorder %v281_v51, %v2691_v2  ;;  %v3724_v51 = vmov 0 }
 0x19b   : > { %vm2705_vm3 = vmand %vm2649_vm0, %vm1091_vm9  ;;  %vm857_vm1 = vcmp.eq.f32.partialorder %v768_v11, %v2420_v19  ;;  %1940 = vset.pattern.permute.xlu1 %v3645_v63  ;;  %v1236_v35 = vpop.permute.xlu1 %1235  ;;  %vm1351_vm0 = vcmp.eq.f32.partialorder %v2436_v22, %v2482_v14  ;;  %v3705_v22 = vmov 0 }
 0x19c   : > { %vm2713_vm7 = vmand %vm639_vm10, %vm849_vm5  ;;  %vm1364_vm15 = vcmp.eq.f32.partialorder %v1236_v35, %v2480_v30  ;;  %vm1365_vm8 = vcmp.eq.f32.partialorder %v1236_v35, %v2482_v14  ;;  %1037 = vperm.xlu1 %1940, %v2240_v52   ;;  %vm316_vm10 = vcmp.lt.s32.totalorder %v280_v47, %v2691_v2 }
 0x19d   : > { %v3697_v15 = vsel %vm2713_vm7, 4294967295, %v3696_v15  ;;  %vm2722_vm9 = vmand %vm647_vm4, %vm857_vm1  ;;  %vm821_vm4 = vcmp.eq.f32.partialorder %v2373_v55, %v2420_v19 }
 0x19e   : > { %3698 = vst [vmem:[#allocation33_spill] sm:$0xff] %v3697_v15  ;;  %v3700_v7 = vsel %vm2722_vm9, 4294967295, %v3699_v7  ;;  %vm2733_vm7 = vmand %vm2695_vm13, %vm1364_vm15  ;;  %v2737_v43 = vpop.permute.xlu0 %771  ;;  %1948 = vset.pattern.permute.xlu0 %v3643_v8  ;;  %vm800_vm15 = vcmp.eq.f32.partialorder %v2523_v45, %v2454_v23 }
 0x19f   : > { %3701 = vst [vmem:[#allocation34_spill] sm:$0xff] %v3700_v7  ;;  %v3703_v17 = vsel %vm2733_vm7, 4294967295, %v3702_v17  ;;  %3704 = vst [vmem:[#allocation35_spill] sm:$0xff] %v2737_v43  ;;  %v2751_v47 = vpop.permute.xlu1 %1239  ;;  %1323 = vperm.xlu0 %1948, %v2218_v46   ;;  %vm1348_vm7 = vcmp.eq.f32.partialorder %v2446_v39, %v2480_v30 }
 0x1a0   : > { %vm2747_vm5 = vmand %vm2705_vm3, %vm1365_vm8  ;;  %1941 = vset.pattern.permute.xlu1 %v3643_v8  ;;  %vm801_vm8 = vcmp.eq.f32.partialorder %v2523_v45, %v2420_v19 }
 0x1a1   : > { %v3706_v22 = vsel %vm2747_vm5, 4294967295, %v3705_v22  ;;  %vm2756_vm13 = vmand %vm2677_vm6, %vm1351_vm0  ;;  %1311 = vperm.xlu1 %1941, %v2240_v52   ;;  %vm3711_vm6 = vcmp.eq.f32.partialorder %v2373_v55, %v2454_v23  ;;  %vm3712_vm0 = vcmp.eq.f32.partialorder %v2326_v60, %v2458_v56  ;;  %vm3718_vm5 = vcmp.eq.f32.partialorder %v2326_v60, %v2417_v31 }
 0x1a2   : > { %vm2765_vm3 = vmand %vm2684_vm11, %vm316_vm10  ;;  %vm590_vm11 = vcmp.eq.f32.partialorder %v2262_v5, %v2458_v56  ;;  %vm3715_vm10 = vnez %v3657_v13  ;;  %v3719_v52 = vmov 0  ;;  %v283_v55 = vadd.s32 32, %v2285_v61 }
 0x1a3   : > { %vm2778_vm1 = vmand %vm3712_vm0, %vm3711_vm6  ;;  %vm591_vm6 = vcmp.eq.f32.partialorder %v2262_v5, %v2417_v31  ;;  %v930_v13 = vpop.permute.xlu0 %929  ;;  %v284_v60 = vadd.s32 40, %v2285_v61 }
 0x1a4   : > { %v3714_v37 = vsel %vm2778_vm1, 4294967295, %v3713_v37  ;;  %vm2786_vm9 = vmand %vm3715_vm10, %vm318_vm2  ;;  %vm1075_vm10 = vcmp.eq.f32.partialorder %v930_v13, %v2470_v28  ;;  %v970_v5 = vpop.permute.xlu1 %969 }
 0x1a5   : > { %v3717_v32 = vsel %vm2786_vm9, 4294967295, %v3716_v32  ;;  %vm2793_vm12 = vmand %vm3718_vm5, %vm821_vm4  ;;  %vm1074_vm4 = vcmp.eq.f32.partialorder %v930_v13, %v2464_v9  ;;  %1942 = vset.pattern.permute.xlu1 %v3645_v63  ;;  %vm1349_vm5 = vcmp.eq.f32.partialorder %v2446_v39, %v2482_v14  ;;  %vm1095_vm1 = vcmp.eq.f32.partialorder %v970_v5, %v2470_v28 }
 0x1a6   : > { %v3720_v52 = vsel %vm2793_vm12, 4294967295, %v3719_v52  ;;  %vm864_vm0 = vmand %vm590_vm11, %vm800_vm15  ;;  %vm596_vm15 = vcmp.eq.f32.partialorder %v2270_v18, %v2458_v56  ;;  %vm597_vm11 = vcmp.eq.f32.partialorder %v2270_v18, %v2417_v31  ;;  %1041 = vperm.xlu1 %1942, %v2210_v44  }
 0x1a7   : > { %vm2802_vm2 = vmand %vm591_vm6, %vm801_vm8  ;;  %vm324_vm6 = vcmp.lt.s32.totalorder %v284_v60, %v2691_v2  ;;  %v942_v45 = vpop.permute.xlu0 %941  ;;  %v3764_v60 = vmov 0 }
 0x1a8   : > { %vm1138_vm8 = vmand %vm864_vm0, %vm1074_vm4  ;;  %vm322_vm0 = vcmp.lt.s32.totalorder %v283_v55, %v2691_v2  ;;  %v2852_v39 = vpop.permute.xlu1 %973 }
 0x1a9   : > { %vm2825_vm9 = vmand %vm596_vm15, %vm3723_vm14  ;;  %vm3726_vm14 = vcmp.eq.f32.partialorder %v2526_v34, %v2420_v19  ;;  %v3729_v34 = vmov 0.0  }
 0x1aa   : > { %v3725_v51 = vsel %vm2825_vm9, 4294967295, %v3724_v51  ;;  %vm1139_vm4 = vmand %vm2802_vm2, %vm1075_vm10  ;;  %vm1094_vm2 = vcmp.eq.f32.partialorder %v970_v5, %v2464_v9  ;;  %vm822_vm10 = vcmp.eq.f32.partialorder %v2538_v48, %v2454_v23  ;;  %v1543_v35 = vsel %vm2756_vm13, 1.0, %v3729_v34  ;;  %1944 = vset.pattern.permute.xlu1 %v3643_v8 }
 0x1ab   : > { %vm2841_vm15 = vmand %vm597_vm11, %vm3726_vm14  ;;  %vm812_vm11 = vcmp.eq.f32.partialorder %v2363_v4, %v2454_v23  ;;  %v1542_v43 = vsel %vm2765_vm3, 1.0, %v3729_v34  ;;  %vm3731_vm13 = vnez %v3714_v37  ;;  %vm3733_vm3 = vcmp.eq.f32.partialorder %v2297_v6, %v2458_v56  ;;  %1315 = vperm.xlu1 %1944, %v2210_v44  }
 0x1ac   : > { %vm1412_vm9 = vmand %vm1138_vm8, %vm1348_vm7  ;;  %vm823_vm7 = vcmp.eq.f32.partialorder %v2538_v48, %v2420_v19  ;;  %vm3730_vm8 = vcmp.lt.s32.totalorder %v2285_v61, %v2691_v2  ;;  %v3746_v48 = vmov 0 }
 0x1ad   : > { %vm1413_vm12 = vmand %vm1139_vm4, %vm1349_vm5 }
 0x1ae   : > { %vm1476_vm14 = vmand %vm1412_vm9, %vm3730_vm8  ;;  %v1541_v13 = vsel %vm1413_vm12, 1.0, %v3729_v34  ;;  %vm3732_vm12 = vnez %v3659_v29  ;;  %vm1368_vm9 = vcmp.eq.f32.partialorder %v2501_v25, %v2480_v30 }
 0x1af   : > { %v1540_v20 = vsel %vm1476_vm14, 1.0, %v3729_v34  ;;  %v1642_v7 = vadd.f32 %v1543_v35, %v1541_v13  ;;  %vm1158_vm4 = vmand %vm3731_vm13, %vm1094_vm2  ;;  %v1545_v15 = vsel %vm3732_vm12, 1.0, %v3729_v34  ;;  %vm3736_vm2 = vnez %v3664_v50  ;;  %1945 = vset.pattern.permute.xlu1 %v3662_v16  ;;  %v1952_v50 = vld [vmem:[%s2119_s29 + $0xf8] sm:$0xff]  ;;  %s3559_s29 = scalar_lea.hbm %s3605_s2, %s1845_s24 }
 0x1b0   : > { %vm2887_vm8 = vmand %vm3733_vm3, %vm822_vm10  ;;  %v1605_v37 = vadd.f32 %v1542_v43, %v1540_v20  ;;  %vm3739_vm13 = vnez %v3720_v52  ;;  %v282_v35 = vadd.s32 24, %v2285_v61  ;;  %vm3740_vm10 = vnez %v3717_v32  ;;  %775 = vperm.xlu1 %1945, %v2218_v46  }
 0x1b1   : > { %vm2895_vm14 = vmand %vm3736_vm2, %vm322_vm0  ;;  %v1544_v55 = vsel %vm3740_vm10, 1.0, %v3729_v34  ;;  %vm1369_vm0 = vcmp.eq.f32.partialorder %v2501_v25, %v2482_v14  ;;  %vm3741_vm3 = vcmp.eq.f32.partialorder %v2297_v6, %v2417_v31  ;;  %v3744_v43 = vmov 0 }
 0x1b2   : > { %vm1159_vm12 = vmand %vm3739_vm13, %vm1095_vm1  ;;  %v1643_v44 = vadd.f32 %v1642_v7, %v1545_v15  ;;  %vm1080_vm13 = vcmp.eq.f32.partialorder %v942_v45, %v2464_v9  ;;  %vm603_vm10 = vcmp.eq.f32.partialorder %v2281_v59, %v2417_v31  ;;  %v287_v25 = vadd.s32 64, %v2285_v61  ;;  %v2943_v7 = vpop.permute.xlu1 %1247 }
 0x1b3   : > { %vm2916_vm2 = vmand %vm3741_vm3, %vm823_vm7  ;;  %v1606_v6 = vadd.f32 %v1605_v37, %v1544_v55  ;;  %vm1081_vm7 = vcmp.eq.f32.partialorder %v942_v45, %v2470_v28  ;;  %v3752_v32 = vmov 0  ;;  %vm3754_vm3 = vcmp.eq.f32.partialorder %v2363_v4, %v2420_v19  ;;  %v954_v4 = vpop.permute.xlu0 %953 }
 0x1b4   : > { %vm2920_vm1 = vmand %vm1158_vm4, %vm1368_vm9  ;;  %vm3748_vm4 = vcmp.eq.f32.partialorder %v2281_v59, %v2458_v56  ;;  %v3755_v52 = vmov 0  ;;  %1946 = vset.pattern.permute.xlu1 %v3643_v8  ;;  %v3802_v46 = vmov 0 }
 0x1b5   : > { %v3745_v43 = vsel %vm2920_vm1, 4294967295, %v3744_v43  ;;  %vm2928_vm5 = vmand %vm1159_vm12, %vm1369_vm0  ;;  %vm3751_vm12 = vnez %v3668_v24  ;;  %1319 = vperm.xlu1 %1946, %v2244_v53   ;;  %v290_v53 = vadd.s32 88, %v2285_v61 }
 0x1b6   : > { %v3747_v48 = vsel %vm2928_vm5, 4294967295, %v3746_v48  ;;  %vm2939_vm9 = vmand %vm3748_vm4, %vm812_vm11  ;;  %vm3757_vm4 = vnez %v3725_v51  ;;  %v2975_v59 = vpop.permute.xlu1 %1251 }
 0x1b7   : > { %vm2949_vm0 = vmand %vm3751_vm12, %vm324_vm6  ;;  %vm1354_vm6 = vcmp.eq.f32.partialorder %v2541_v10, %v2480_v30  ;;  %vm3759_vm12 = vnez %v3683_v42  ;;  %v285_v42 = vadd.s32 48, %v2285_v61  ;;  %v966_v29 = vpop.permute.xlu0 %965 }
 0x1b8   : > { %v3753_v32 = vsel %vm2949_vm0, 4294967295, %v3752_v32  ;;  %vm2956_vm5 = vmand %vm603_vm10, %vm3754_vm3  ;;  %vm1355_vm10 = vcmp.eq.f32.partialorder %v2541_v10, %v2482_v14  ;;  %vm330_vm3 = vcmp.lt.s32.totalorder %v287_v25, %v2691_v2  ;;  %v289_v10 = vadd.s32 80, %v2285_v61 }
 0x1b9   : > { %v3756_v52 = vsel %vm2956_vm5, 4294967295, %v3755_v52  ;;  %vm1144_vm1 = vmand %vm3757_vm4, %vm1080_vm13  ;;  %vm819_vm4 = vcmp.eq.f32.partialorder %v2534_v1, %v2420_v19  ;;  %vm3762_vm13 = vcmp.lt.s32.totalorder %v282_v35, %v2691_v2  ;;  %1947 = vset.pattern.permute.xlu1 %v3662_v16  ;;  %v288_v16 = vadd.s32 72, %v2285_v61 }
 0x1ba   : > { %vm1145_vm0 = vmand %vm2841_vm15, %vm1081_vm7  ;;  %vm3758_vm7 = vcmp.lt.s32.totalorder %v286_v58, %v2691_v2  ;;  %v3064_v20 = vpop.permute.xlu1 %981  ;;  %779 = vperm.xlu1 %1947, %v1952_v50  }
 0x1bb   : > { %vm1418_vm11 = vmand %vm1144_vm1, %vm1354_vm6  ;;  %vm1097_vm6 = vcmp.eq.f32.partialorder %v2852_v39, %v2470_v28 }
 0x1bc   : > { %vm2985_vm5 = vmand %vm3759_vm12, %vm3758_vm7  ;;  %vm609_vm7 = vcmp.eq.f32.partialorder %v2294_v3, %v2417_v31  ;;  %vm3770_vm12 = vcmp.eq.f32.partialorder %v2294_v3, %v2458_v56  ;;  %v3776_v3 = vmov 0 }
 0x1bd   : > { %vm1419_vm1 = vmand %vm1145_vm0, %vm1355_vm10  ;;  %vm3763_vm0 = vnez %v3703_v17  ;;  %v3811_v17 = vld [vmem:[#allocation7_spill] sm:$0xff] }
 0x1be   : > { %vm1482_vm15 = vmand %vm1418_vm11, %vm3762_vm13  ;;  %v1547_v24 = vsel %vm1419_vm1, 1.0, %v3729_v34  ;;  %vm3766_vm11 = vcmp.eq.f32.partialorder %v2852_v39, %v2464_v9  ;;  %vm1087_vm1 = vcmp.eq.f32.partialorder %v954_v4, %v2470_v28  ;;  %1949 = vset.pattern.permute.xlu1 %v3645_v63  ;;  %v291_v63 = vadd.s32 96, %v2285_v61 }
 0x1bf   : > { %vm3005_vm10 = vmand %vm3763_vm0, %vm330_vm3  ;;  %v1546_v5 = vsel %vm1482_vm15, 1.0, %v3729_v34  ;;  %v1644_v51 = vadd.f32 %v1643_v44, %v1547_v24  ;;  %vm3769_vm0 = vcmp.eq.f32.partialorder %v2534_v1, %v2454_v23  ;;  %1053 = vperm.xlu1 %1949, %v1952_v50  }
 0x1c0   : > { %v3765_v60 = vsel %vm3005_vm10, 4294967295, %v3764_v60  ;;  %vm3015_vm13 = vmand %vm2887_vm8, %vm3766_vm11  ;;  %vm3773_vm11 = vnez %v3666_v12  ;;  %v1607_v13 = vadd.f32 %v1606_v6, %v1546_v5  ;;  %v1548_v12 = vsel %vm2895_vm14, 1.0, %v3729_v34  ;;  %v3831_v6 = vld [vmem:[#allocation18_spill] sm:$0xff] }
 0x1c1   : > { %vm3031_vm8 = vmand %vm3770_vm12, %vm3769_vm0  ;;  %v1549_v58 = vsel %vm3773_vm11, 1.0, %v3729_v34  ;;  %vm3780_vm11 = vnez %v3756_v52  ;;  %vm614_vm14 = vcmp.eq.f32.partialorder %v2333_v0, %v2458_v56  ;;  %vm3786_vm0 = vcmp.lt.s32.totalorder %v285_v42, %v2691_v2 }
 0x1c2   : > { %vm3043_vm15 = vmand %vm2916_vm2, %vm1097_vm6  ;;  %v1645_v39 = vadd.f32 %v1644_v51, %v1549_v58  ;;  %vm3778_vm2 = vcmp.eq.f32.partialorder %v954_v4, %v2464_v9  ;;  %v1608_v11 = vadd.f32 %v1607_v13, %v1548_v12  ;;  %v3796_v52 = vmov 0  ;;  %v3813_v58 = vld [vmem:[#allocation20_spill] sm:$0xff] }
 0x1c3   : > { %vm3051_vm12 = vmand %vm609_vm7, %vm819_vm4  ;;  %vm3779_vm4 = vnez %v3670_v40  ;;  %vm1360_vm7 = vcmp.eq.f32.partialorder %v2607_v21, %v2480_v30  ;;  %1950 = vset.pattern.permute.xlu1 %v3643_v8  ;;  %v292_v8 = vadd.s32 104, %v2285_v61 }
 0x1c4   : > { %v3777_v3 = vsel %vm3051_vm12, 4294967295, %v3776_v3  ;;  %vm1150_vm6 = vmand %vm2939_vm9, %vm3778_vm2  ;;  %v1551_v1 = vsel %vm3779_vm4, 1.0, %v3729_v34  ;;  %vm3781_vm9 = vnez %v3753_v32  ;;  %vm1361_vm2 = vcmp.eq.f32.partialorder %v2607_v21, %v2482_v14  ;;  %1327 = vperm.xlu1 %1950, %v1952_v50   ;;  %v3828_v50 = vld [vmem:[#allocation21_spill] sm:$0xff] }
 0x1c5   : > { %vm1151_vm3 = vmand %vm3780_vm11, %vm1087_vm1  ;;  %v1550_v37 = vsel %vm3781_vm9, 1.0, %v3729_v34  ;;  %v1646_v40 = vadd.f32 %v1645_v39, %v1551_v1  ;;  %vm615_vm11 = vcmp.eq.f32.partialorder %v2333_v0, %v2417_v31  ;;  %vm3782_vm9 = vcmp.lt.s32.totalorder %v289_v10, %v2691_v2  ;;  %v978_v10 = vpop.permute.xlu0 %977 }
 0x1c6   : > { %vm1424_vm4 = vmand %vm1150_vm6, %vm1360_vm7  ;;  %v1609_v35 = vadd.f32 %v1608_v11, %v1550_v37  ;;  %vm3783_vm6 = vnez %v3745_v43  ;;  %v3111_v43 = vpop.permute.xlu1 %985 }
 0x1c7   : > { %vm1425_vm12 = vmand %vm1151_vm3, %vm1361_vm2  ;;  %vm336_vm3 = vcmp.lt.s32.totalorder %v290_v53, %v2691_v2  ;;  %vm3787_vm2 = vcmp.eq.f32.partialorder %v2378_v33, %v2454_v23 }
 0x1c8   : > { %vm3094_vm7 = vmand %vm3783_vm6, %vm3782_vm9  ;;  %v1553_v55 = vsel %vm1425_vm12, 1.0, %v3729_v34  ;;  %vm3790_vm12 = vcmp.eq.f32.partialorder %v2943_v7, %v2480_v30  ;;  %vm826_vm6 = vcmp.eq.f32.partialorder %v2549_v38, %v2454_v23 }
 0x1c9   : > { %vm1488_vm10 = vmand %vm1424_vm4, %vm3786_vm0  ;;  %v1647_v25 = vadd.f32 %v1646_v40, %v1553_v55  ;;  %vm1092_vm4 = vcmp.eq.f32.partialorder %v966_v29, %v2464_v9  ;;  %v1560_v1 = vsel %vm3094_vm7, 1.0, %v3729_v34  ;;  %vm1101_vm7 = vcmp.eq.f32.partialorder %v3064_v20, %v2470_v28 }
 0x1ca   : > { %vm3106_vm1 = vmand %vm614_vm14, %vm3787_vm2  ;;  %v1552_v44 = vsel %vm1488_vm10, 1.0, %v3729_v34  ;;  %vm3791_vm14 = vcmp.eq.f32.partialorder %v2378_v33, %v2420_v19  ;;  %vm3794_vm10 = vnez %v3685_v62  ;;  %v3798_v33 = vld [vmem:[#allocation6_spill] sm:$0xff]  ;;  %v1554_v62 = vsel %vm2985_vm5, 1.0, %v3729_v34  ;;  %v3183_v51 = vpop.permute.xlu1 %1259 }
 0x1cb   : > { %vm1434_vm0 = vmand %vm3015_vm13, %vm3790_vm12  ;;  %v1555_v15 = vsel %vm3794_vm10, 1.0, %v3729_v34  ;;  %v1610_v32 = vadd.f32 %v1609_v35, %v1552_v44  ;;  %vm3795_vm13 = vcmp.eq.f32.partialorder %v2943_v7, %v2482_v14  ;;  %vm616_vm12 = vcmp.eq.f32.partialorder %v3798_v33, %v2458_v56  ;;  %v990_v35 = vpop.permute.xlu0 %989  ;;  %v3829_v44 = vld [vmem:[#allocation23_spill] sm:$0xff] }
 0x1cc   : > { %vm3123_vm9 = vmand %vm615_vm11, %vm3791_vm14  ;;  %vm1093_vm11 = vcmp.eq.f32.partialorder %v966_v29, %v2470_v28  ;;  %v1648_v4 = vadd.f32 %v1647_v25, %v1555_v15  ;;  %v3799_v7 = vmov 0  ;;  %v3830_v25 = vld [vmem:[#allocation17_spill] sm:$0xff] }
 0x1cd   : > { %vm3137_vm2 = vmand %vm3043_vm15, %vm3795_vm13  ;;  %vm617_vm15 = vcmp.eq.f32.partialorder %v3798_v33, %v2417_v31  ;;  %vm3801_vm13 = vnez %v3706_v22  ;;  %v1611_v42 = vadd.f32 %v1610_v32, %v1554_v62  ;;  %v293_v33 = vadd.s32 112, %v2285_v61 }
 0x1ce   : > { %v3797_v52 = vsel %vm3137_vm2, 4294967295, %v3796_v52  ;;  %vm3151_vm10 = vmand %vm1434_vm0, %vm336_vm3  ;;  %v1557_v24 = vsel %vm3801_vm13, 1.0, %v3729_v34  ;;  %vm3804_vm0 = vnez %v3765_v60  ;;  %vm1366_vm13 = vcmp.eq.f32.partialorder %v2751_v47, %v2480_v30  ;;  %v3241_v53 = vpop.permute.xlu1 %993 }
 0x1cf   : > { %v3800_v7 = vsel %vm3151_vm10, 4294967295, %v3799_v7  ;;  %vm1156_vm5 = vmand %vm3031_vm8, %vm1092_vm4  ;;  %v1556_v22 = vsel %vm3804_vm0, 1.0, %v3729_v34  ;;  %v1649_v5 = vadd.f32 %v1648_v4, %v1557_v24  ;;  %vm3805_vm8 = vnez %v3777_v3 }
 0x1d0   : > { %vm3169_vm3 = vmand %vm616_vm12, %vm826_vm6  ;;  %vm3806_vm6 = vcmp.eq.f32.partialorder %v2549_v38, %v2420_v19  ;;  %vm1367_vm0 = vcmp.eq.f32.partialorder %v2751_v47, %v2482_v14  ;;  %v1612_v18 = vadd.f32 %v1611_v42, %v1556_v22  ;;  %vm1099_vm10 = vcmp.eq.f32.partialorder %v978_v10, %v2470_v28  ;;  %v3812_v47 = vld [vmem:[#allocation16_spill] sm:$0xff] }
 0x1d1   : > { %v3803_v46 = vsel %vm3169_vm3, 4294967295, %v3802_v46  ;;  %vm1157_vm4 = vmand %vm3805_vm8, %vm1093_vm11  ;;  %vm1098_vm3 = vcmp.eq.f32.partialorder %v978_v10, %v2464_v9  ;;  %vm3199_vm2 = vcmp.lt.s32.totalorder %v3690_v54, 256  ;;  %v3809_v38 = vmov 0 }
 0x1d2   : > { %vm3188_vm12 = vmand %vm617_vm15, %vm3806_vm6  ;;  %v3810_v38 = vsel %vm3199_vm2, 4294967295, %v3809_v38  ;;  %vm620_vm15 = vcmp.eq.f32.partialorder %v3811_v17, %v2458_v56  ;;  %277 = vst.msk [vmem:[#allocation2] sm:$0x3] %vm3199_vm2, %v3729_v34  ;;  %vm623_vm2 = vcmp.eq.f32.partialorder %v3830_v25, %v2417_v31  ;;  %v295_v10 = vadd.s32 128, %v2285_v61 }
 0x1d3   : > { %vm1430_vm14 = vmand %vm1156_vm5, %vm1366_vm13  ;;  %vm828_vm5 = vcmp.eq.f32.partialorder %v3813_v58, %v2454_v23  ;;  %vm3814_vm13 = vcmp.lt.s32.totalorder %v288_v16, %v2691_v2  ;;  %v3288_v16 = vpop.permute.xlu1 %1263  ;;  %v3346_v24 = vadd.s32 128, %v2691_v2 }
 0x1d4   : > { %vm1431_vm8 = vmand %vm1157_vm4, %vm1367_vm0  ;;  %vm338_vm0 = vcmp.lt.s32.totalorder %v291_v63, %v2691_v2  ;;  %vm3823_vm4 = vnez %v3800_v7 }
 0x1d5   : > { %vm1494_vm11 = vmand %vm1430_vm14, %vm3814_vm13  ;;  %v1559_v13 = vsel %vm1431_vm8, 1.0, %v3729_v34  ;;  %vm3815_vm14 = vcmp.eq.f32.partialorder %v2558_v27, %v2454_v23  ;;  %vm1372_vm13 = vcmp.eq.f32.partialorder %v2975_v59, %v2480_v30  ;;  %v1562_v37 = vsel %vm3823_vm4, 1.0, %v3729_v34  ;;  %v3853_v23 = vld [vmem:[#allocation19_spill] sm:$0xff] }
 0x1d6   : > { %v1558_v54 = vsel %vm1494_vm11, 1.0, %v3729_v34  ;;  %v1650_v45 = vadd.f32 %v1649_v5, %v1559_v13  ;;  %vm1162_vm6 = vmand %vm3106_vm1, %vm1098_vm3  ;;  %vm3818_vm11 = vnez %v3747_v48  ;;  %vm1373_vm3 = vcmp.eq.f32.partialorder %v2975_v59, %v2482_v14 }
 0x1d7   : > { %vm3227_vm8 = vmand %vm620_vm15, %vm3815_vm14  ;;  %v1561_v12 = vsel %vm3818_vm11, 1.0, %v3729_v34  ;;  %v1613_v39 = vadd.f32 %v1612_v18, %v1558_v54  ;;  %vm1100_vm14 = vcmp.eq.f32.partialorder %v3064_v20, %v2464_v9  ;;  %vm1374_vm4 = vcmp.eq.f32.partialorder %v2505_v49, %v2480_v30  ;;  %v998_v7 = vpop.permute.xlu1 %997 }
 0x1d8   : > { %vm1163_vm1 = vmand %vm3123_vm9, %vm1099_vm10  ;;  %v1651_v48 = vadd.f32 %v1650_v45, %v1561_v12  ;;  %vm619_vm9 = vcmp.eq.f32.partialorder %v3812_v47, %v2417_v31  ;;  %vm3819_vm10 = vnez %v3797_v52  ;;  %v299_v59 = vadd.s32 160, %v2285_v61 }
 0x1d9   : > { %vm1436_vm15 = vmand %vm1162_vm6, %vm1372_vm13  ;;  %v1563_v11 = vsel %vm3819_vm10, 1.0, %v3729_v34  ;;  %v1614_v29 = vadd.f32 %v1613_v39, %v1560_v1  ;;  %vm3820_vm6 = vcmp.eq.f32.partialorder %v3812_v47, %v2458_v56  ;;  %v3847_v47 = vld [vmem:[#allocation9_spill] sm:$0xff]  ;;  %v298_v39 = vadd.s32 152, %v2285_v61 }
 0x1da   : > { %vm1437_vm11 = vmand %vm1163_vm1, %vm1373_vm3  ;;  %v1652_v40 = vadd.f32 %v1651_v48, %v1563_v11  ;;  %vm3824_vm3 = vcmp.eq.f32.partialorder %v3813_v58, %v2420_v19  ;;  %v305_v13 = vadd.s32 208, %v2285_v61 }
 0x1db   : > { %vm3263_vm13 = vmand %vm3820_vm6, %vm828_vm5  ;;  %v1615_v56 = vadd.f32 %v1614_v29, %v1562_v37  ;;  %v1565_v20 = vsel %vm1437_vm11, 1.0, %v3729_v34  ;;  %vm3827_vm5 = vnez %v3803_v46  ;;  %v1272_v42 = vpop.permute.xlu1 %1271  ;;  %v3840_v46 = vld [vmem:[#allocation8_spill] sm:$0xff] }
 0x1dc   : > { %vm1500_vm1 = vmand %vm1436_vm15, %vm338_vm0  ;;  %v1653_v55 = vadd.f32 %v1652_v40, %v1565_v20  ;;  %vm340_vm0 = vcmp.lt.s32.totalorder %v292_v8, %v2691_v2  ;;  %v3852_v37 = vld [vmem:[#allocation24_spill] sm:$0xff] }
 0x1dd   : > { %vm3275_vm10 = vmand %vm619_vm9, %vm3824_vm3  ;;  %v1564_v21 = vsel %vm1500_vm1, 1.0, %v3729_v34  ;;  %vm1375_vm9 = vcmp.eq.f32.partialorder %v2505_v49, %v2482_v14  ;;  %vm833_vm3 = vcmp.eq.f32.partialorder %v3828_v50, %v2420_v19  ;;  %vm837_vm1 = vcmp.eq.f32.partialorder %v3829_v44, %v2420_v19 }
 0x1de   : > { %vm1164_vm6 = vmand %vm3827_vm5, %vm1100_vm14  ;;  %v1616_v0 = vadd.f32 %v1615_v56, %v1564_v21  ;;  %vm1104_vm14 = vcmp.eq.f32.partialorder %v990_v35, %v2464_v9  ;;  %v300_v21 = vadd.s32 168, %v2285_v61 }
 0x1df   : > { %vm1165_vm15 = vmand %vm3188_vm12, %vm1101_vm7  ;;  %vm627_vm12 = vcmp.eq.f32.partialorder %v3831_v6, %v2417_v31 }
 0x1e0   : > { %vm1438_vm11 = vmand %vm1164_vm6, %vm1374_vm4  ;;  %vm1102_vm6 = vcmp.eq.f32.partialorder %v3111_v43, %v2464_v9 }
 0x1e1   : > { %vm1439_vm5 = vmand %vm1165_vm15, %vm1375_vm9  ;;  %vm1103_vm15 = vcmp.eq.f32.partialorder %v3111_v43, %v2470_v28  ;;  %v1002_v43 = vpop.permute.xlu0 %1001 }
 0x1e2   : > { %vm1502_vm7 = vmand %vm1438_vm11, %vm340_vm0  ;;  %v1567_v49 = vsel %vm1439_vm5, 1.0, %v3729_v34  ;;  %vm831_vm0 = vcmp.eq.f32.partialorder %v2558_v27, %v2420_v19  ;;  %v3858_v27 = vld [vmem:[#allocation32_spill] sm:$0xff] }
 0x1e3   : > { %v1566_v15 = vsel %vm1502_vm7, 1.0, %v3729_v34  ;;  %v1654_v32 = vadd.f32 %v1653_v55, %v1567_v49  ;;  %vm3307_vm4 = vmand %vm3227_vm8, %vm1104_vm14  ;;  %vm1376_vm14 = vcmp.eq.f32.partialorder %v3183_v51, %v2480_v30  ;;  %v3854_v55 = vld [vmem:[#allocation31_spill] sm:$0xff] }
 0x1e4   : > { %v1617_v62 = vadd.f32 %v1616_v0, %v1566_v15  ;;  %vm3316_vm9 = vmand %vm627_vm12, %vm837_vm1  ;;  %vm621_vm1 = vcmp.eq.f32.partialorder %v3811_v17, %v2417_v31  ;;  %vm1377_vm12 = vcmp.eq.f32.partialorder %v3183_v51, %v2482_v14  ;;  %v294_v51 = vadd.s32 120, %v2285_v61  ;;  %v3855_v0 = vld [vmem:[#allocation10_spill] sm:$0xff] }
 0x1e5   : > { %vm3323_vm8 = vmand %vm623_vm2, %vm833_vm3  ;;  %vm342_vm3 = vcmp.lt.s32.totalorder %v293_v33, %v2691_v2  ;;  %v1014_v56 = vpop.permute.xlu0 %1013  ;;  %v3856_v33 = vld [vmem:[#allocation28_spill] sm:$0xff] }
 0x1e6   : > { %vm1166_vm11 = vmand %vm3263_vm13, %vm1102_vm6  ;;  %vm835_vm13 = vcmp.eq.f32.partialorder %v2578_v36, %v2420_v19 }
 0x1e7   : > { %vm1167_vm5 = vmand %vm3275_vm10, %vm1103_vm15  ;;  %vm1105_vm10 = vcmp.eq.f32.partialorder %v990_v35, %v2470_v28  ;;  %vm625_vm15 = vcmp.eq.f32.partialorder %v3840_v46, %v2417_v31 }
 0x1e8   : > { %vm3337_vm2 = vmand %vm621_vm1, %vm831_vm0  ;;  %vm1111_vm0 = vcmp.eq.f32.partialorder %v1002_v43, %v2470_v28  ;;  %v3859_v43 = vld [vmem:[#allocation11_spill] sm:$0xff] }
 0x1e9   : > { %vm1440_vm7 = vmand %vm1166_vm11, %vm1376_vm14  ;;  %vm1107_vm11 = vcmp.eq.f32.partialorder %v3241_v53, %v2470_v28  ;;  %v1026_v46 = vpop.permute.xlu0 %1025 }
 0x1ea   : > { %vm1441_vm6 = vmand %vm1167_vm5, %vm1377_vm12  ;;  %vm839_vm5 = vcmp.eq.f32.partialorder %v2587_v57, %v2420_v19  ;;  %v1276_v57 = vpop.permute.xlu1 %1275 }
 0x1eb   : > { %vm1504_vm1 = vmand %vm1440_vm7, %vm342_vm3  ;;  %v1569_v22 = vsel %vm1441_vm6, 1.0, %v3729_v34  ;;  %vm347_vm3 = vcmp.lt.s32.totalorder %v295_v10, %v3346_v24 }
 0x1ec   : > { %vm3355_vm14 = vmand %vm625_vm15, %vm835_vm13  ;;  %v1568_v5 = vsel %vm1504_vm1, 1.0, %v3729_v34  ;;  %v1655_v63 = vadd.f32 %v1654_v32, %v1569_v22  ;;  %vm1381_vm13 = vcmp.eq.f32.partialorder %v2509_v41, %v2482_v14  ;;  %vm1379_vm1 = vcmp.eq.f32.partialorder %v3288_v16, %v2482_v14 }
 0x1ed   : > { %vm3365_vm12 = vmand %vm3337_vm2, %vm1105_vm10  ;;  %v1618_v18 = vadd.f32 %v1617_v62, %v1568_v5  ;;  %vm1378_vm2 = vcmp.eq.f32.partialorder %v3288_v16, %v2480_v30  ;;  %vm629_vm10 = vcmp.eq.f32.partialorder %v3847_v47, %v2417_v31  ;;  %v296_v41 = vadd.s32 136, %v2285_v61 }
 0x1ee   : > { %vm3374_vm7 = vmand %vm3316_vm9, %vm1111_vm0  ;;  %v297_v30 = vadd.s32 144, %v2285_v61  ;;  %v1006_v45 = vpop.permute.xlu1 %1005  ;;  %v301_v32 = vadd.s32 176, %v2285_v61  ;;  %v303_v5 = vadd.s32 192, %v2285_v61 }
 0x1ef   : > { %vm1171_vm6 = vmand %vm3323_vm8, %vm1107_vm11  ;;  %vm344_vm8 = vcmp.lt.s32.totalorder %v294_v51, %v2691_v2  ;;  %v3860_v51 = vld [vmem:[#allocation33_spill] sm:$0xff] }
 0x1f0   : > { %vm1445_vm15 = vmand %vm1171_vm6, %vm1381_vm13  ;;  %vm1109_vm13 = vcmp.eq.f32.partialorder %v998_v7, %v2470_v28  ;;  %v302_v7 = vadd.s32 184, %v2285_v61 }
 0x1f1   : > { %vm3387_vm9 = vmand %vm629_vm10, %vm839_vm5  ;;  %vm1383_vm5 = vcmp.eq.f32.partialorder %v1272_v42, %v2482_v14 }
 0x1f2   : > { %vm3391_vm0 = vmand %vm1445_vm15, %vm347_vm3  ;;  %vm349_vm3 = vcmp.lt.s32.totalorder %v296_v41, %v3346_v24  ;;  %vm351_vm15 = vcmp.lt.s32.totalorder %v297_v30, %v3346_v24  ;;  %v1010_v11 = vpop.permute.xlu1 %1009  ;;  %v3862_v30 = vld [vmem:[#allocation12_spill] sm:$0xff] }
 0x1f3   : > { %vm1442_vm11 = vmand %vm3307_vm4, %vm1378_vm2  ;;  %vm1385_vm2 = vcmp.eq.f32.partialorder %v1276_v57, %v2482_v14  ;;  %v1573_v8 = vsel %vm3391_vm0, 1.0, %v3729_v34  ;;  %vm841_vm0 = vcmp.eq.f32.partialorder %v3852_v37, %v2420_v19 }
 0x1f4   : > { %vm1443_vm6 = vmand %vm3365_vm12, %vm1379_vm1 }
 0x1f5   : > { %vm1506_vm10 = vmand %vm1442_vm11, %vm344_vm8  ;;  %v1571_v54 = vsel %vm1443_vm6, 1.0, %v3729_v34  ;;  %vm1113_vm8 = vcmp.eq.f32.partialorder %v1006_v45, %v2470_v28  ;;  %vm1387_vm6 = vcmp.eq.f32.partialorder %v2512_v26, %v2482_v14  ;;  %v3863_v45 = vld [vmem:[#allocation22_spill] sm:$0xff] }
 0x1f6   : > { %v1570_v3 = vsel %vm1506_vm10, 1.0, %v3729_v34  ;;  %v1656_v12 = vadd.f32 %v1655_v63, %v1571_v54  ;;  %vm1173_vm4 = vmand %vm3355_vm14, %vm1109_vm13  ;;  %vm353_vm13 = vcmp.lt.s32.totalorder %v298_v39, %v3346_v24  ;;  %vm1115_vm10 = vcmp.eq.f32.partialorder %v1010_v11, %v2470_v28  ;;  %v1284_v26 = vpop.permute.xlu1 %1283 }
 0x1f7   : > { %v3413_v53 = vadd.f32 %v1618_v18, %v1570_v3  ;;  %vm1447_vm12 = vmand %vm1173_vm4, %vm1383_vm5  ;;  %v304_v39 = vadd.s32 200, %v2285_v61 }
 0x1f8   : > { %vm1511_vm1 = vmand %vm1447_vm12, %vm349_vm3  ;;  %v1657_v1 = vadd.f32 %v1656_v12, %v1573_v8  ;;  %vm631_vm3 = vcmp.eq.f32.partialorder %v3853_v23, %v2417_v31  ;;  %vm355_vm12 = vcmp.lt.s32.totalorder %v299_v59, %v3346_v24 }
 0x1f9   : > { %v1575_v48 = vsel %vm1511_vm1, 1.0, %v3729_v34  ;;  %vm1449_vm14 = vmand %vm3374_vm7, %vm1385_vm2  ;;  %vm1389_vm1 = vcmp.eq.f32.partialorder %v1284_v26, %v2482_v14 }
 0x1fa   : > { %v1658_v29 = vadd.f32 %v1657_v1, %v1575_v48  ;;  %vm1513_vm11 = vmand %vm1449_vm14, %vm351_vm15  ;;  %v1288_v44 = vpop.permute.xlu1 %1287  ;;  %v3866_v48 = vld [vmem:[#allocation30_spill] sm:$0xff] }
 0x1fb   : > { %v1577_v40 = vsel %vm1513_vm11, 1.0, %v3729_v34  ;;  %vm1177_vm5 = vmand %vm3387_vm9, %vm1113_vm8  ;;  %vm843_vm9 = vcmp.eq.f32.partialorder %v3854_v55, %v2420_v19  ;;  %vm1117_vm8 = vcmp.eq.f32.partialorder %v1014_v56, %v2470_v28  ;;  %vm633_vm11 = vcmp.eq.f32.partialorder %v3855_v0, %v2417_v31 }
 0x1fc   : > { %v1659_v35 = vadd.f32 %v1658_v29, %v1577_v40  ;;  %vm1451_vm7 = vmand %vm1177_vm5, %vm1387_vm6  ;;  %vm357_vm6 = vcmp.lt.s32.totalorder %v300_v21, %v3346_v24  ;;  %v3867_v29 = vld [vmem:[#allocation29_spill] sm:$0xff]  ;;  %v307_v0 = vadd.s32 224, %v2285_v61 }
 0x1fd   : > { %vm1515_vm4 = vmand %vm1451_vm7, %vm353_vm13  ;;  %vm1391_vm7 = vcmp.eq.f32.partialorder %v1288_v44, %v2482_v14  ;;  %v3868_v21 = vld [vmem:[#allocation13_spill] sm:$0xff] }
 0x1fe   : > { %v1579_v20 = vsel %vm1515_vm4, 1.0, %v3729_v34  ;;  %vm905_vm2 = vmand %vm631_vm3, %vm841_vm0  ;;  %v1018_v15 = vpop.permute.xlu1 %1017 }
 0x1ff   : > { %v1660_v16 = vadd.f32 %v1659_v35, %v1579_v20  ;;  %vm1179_vm15 = vmand %vm905_vm2, %vm1115_vm10  ;;  %vm1119_vm4 = vcmp.eq.f32.partialorder %v1018_v15, %v2470_v28  ;;  %vm359_vm2 = vcmp.lt.s32.totalorder %v301_v32, %v3346_v24  ;;  %v306_v20 = vadd.s32 216, %v2285_v61 }
 0x200   : > { %vm1453_vm14 = vmand %vm1179_vm15, %vm1389_vm1 }
 0x201   : > { %vm1517_vm13 = vmand %vm1453_vm14, %vm355_vm12  ;;  %vm3857_vm12 = vnez %v3856_v33  ;;  %vm847_vm14 = vcmp.eq.f32.partialorder %v3858_v27, %v2420_v19  ;;  %v309_v33 = vadd.s32 240, %v2285_v61  ;;  %v308_v27 = vadd.s32 232, %v2285_v61 }
 0x202   : > { %vm907_vm0 = vmand %vm633_vm11, %vm843_vm9  ;;  %v1581_v50 = vsel %vm1517_vm13, 1.0, %v3729_v34  ;;  %v1292_v52 = vpop.permute.xlu1 %1291  ;;  %vm637_vm13 = vcmp.eq.f32.partialorder %v3859_v43, %v2417_v31 }
 0x203   : > { %vm1181_vm5 = vmand %vm907_vm0, %vm1117_vm8  ;;  %v1661_v25 = vadd.f32 %v1660_v16, %v1581_v50  ;;  %vm1393_vm15 = vcmp.eq.f32.partialorder %v1292_v52, %v2482_v14 }
 0x204   : > { %vm1455_vm10 = vmand %vm1181_vm5, %vm1391_vm7 }
 0x205   : > { %vm1519_vm3 = vmand %vm1455_vm10, %vm357_vm6  ;;  %vm361_vm6 = vcmp.lt.s32.totalorder %v302_v7, %v3346_v24  ;;  %v3873_v7 = vld [vmem:[#allocation27_spill] sm:$0xff] }
 0x206   : > { %v1583_v6 = vsel %vm1519_vm3, 1.0, %v3729_v34  ;;  %vm1183_vm9 = vmand %vm3857_vm12, %vm1119_vm4  ;;  %v1022_v4 = vpop.permute.xlu1 %1021  ;;  %vm1123_vm4 = vcmp.eq.f32.partialorder %v1026_v46, %v2470_v28  ;;  %vm3861_vm12 = vnez %v3860_v51  ;;  %v1636_v51 = vrot.slane %v3413_v53, 4 }
 0x207   : > { %v1662_v49 = vadd.f32 %v1661_v25, %v1583_v6  ;;  %vm1457_vm1 = vmand %vm1183_vm9, %vm1393_vm15  ;;  %vm1121_vm11 = vcmp.eq.f32.partialorder %v1022_v4, %v2470_v28  ;;  %v3869_v6 = vld [vmem:[#allocation34_spill] sm:$0xff] }
 0x208   : > { %vm1521_vm8 = vmand %vm1457_vm1, %vm359_vm2  ;;  %vm363_vm2 = vcmp.lt.s32.totalorder %v303_v5, %v3346_v24 }
 0x209   : > { %v1585_v62 = vsel %vm1521_vm8, 1.0, %v3729_v34  ;;  %vm911_vm0 = vmand %vm637_vm13, %vm847_vm14  ;;  %v264_v60 = vpop.xlane.xlu0 %263  ;;  %vm641_vm13 = vcmp.eq.f32.partialorder %v3862_v30, %v2417_v31 }
 0x20a   : > { %v1663_v9 = vadd.f32 %v1662_v49, %v1585_v62  ;;  %v1296_v10 = vpop.permute.xlu1 %1295  ;;  %vm1185_vm5 = vmand %vm911_vm0, %vm1121_vm11  ;;  %v265_v18 = vrot.slane %v264_v60, 4  ;;  %vm643_vm0 = vcmp.eq.f32.partialorder %v3863_v45, %v2417_v31  ;;  %v3871_v49 = vld [vmem:[#allocation35_spill] sm:$0xff]  ;;  %v3872_v62 = vld [vmem:[#allocation14_spill] sm:$0xff] }
 0x20b   : > { %vm1395_vm7 = vcmp.eq.f32.partialorder %v1296_v10, %v2482_v14  ;;  %vm1187_vm9 = vmand %vm3861_vm12, %vm1123_vm4 }
 0x20c   : > { %vm1459_vm10 = vmand %vm1185_vm5, %vm1395_vm7  ;;  %v266_v47 = vadd.f32 %v265_v18, %v264_v60  ;;  %vm367_vm7 = vcmp.lt.s32.totalorder %v305_v13, %v3346_v24  ;;  %v3874_v60 = vld [vmem:[#allocation15_spill] sm:$0xff] }
 0x20d   : > { %vm1523_vm3 = vmand %vm1459_vm10, %vm361_vm6 }
 0x20e   : > { %v1587_v42 = vsel %vm1523_vm3, 1.0, %v3729_v34  ;;  %v756_v36 = vpop.permute.xlu1 %755  ;;  %v267_v58 = vrot.slane %v266_v47, 2  ;;  %vm1401_vm3 = vcmp.eq.f32.partialorder %v3866_v48, %v2482_v14 }
 0x20f   : > { %v1664_v22 = vadd.f32 %v1663_v9, %v1587_v42  ;;  %vm851_vm14 = vcmp.eq.f32.partialorder %v756_v36, %v2420_v19 }
 0x210   : > { %v268_v54 = vadd.f32 %v267_v58, %v266_v47  ;;  %vm3475_vm6 = vmand %vm641_vm13, %vm851_vm14  ;;  %v2023_v58 = vmov 1966171168  }
 0x211   : > { %v1030_v8 = vpop.permute.xlu0 %1029  ;;  %v1683_v13 = vunpack.c.l.s4 %v2023_v58 }
 0x212   : > { %v1300_v63 = vpop.permute.xlu1 %1299  ;;  %v269_v1 = vrot.slane %v268_v54, 1 }
 0x213   : > { %vm1397_vm15 = vcmp.eq.f32.partialorder %v1300_v63, %v2482_v14  ;;  %v310_v63 = vadd.s32 248, %v2285_v61 }
 0x214   : > { %vm1461_vm1 = vmand %vm1187_vm9, %vm1397_vm15  ;;  %v270_v11 = vadd.f32 %v269_v1, %v268_v54  ;;  %vm365_vm15 = vcmp.lt.s32.totalorder %v304_v39, %v3346_v24  ;;  %v1604_v1 = vld [vmem:[#allocation2] sm:$0x3] }
 0x215   : > { %vm1525_vm8 = vmand %vm1461_vm1, %vm363_vm2  ;;  %vm1125_vm2 = vcmp.eq.f32.partialorder %v1030_v8, %v2470_v28  ;;  %vm1399_vm1 = vcmp.eq.f32.partialorder %v3867_v29, %v2482_v14  ;;  %v1046_v55 = vpop.permute.xlu0 %1045 }
 0x216   : > { %v1589_v17 = vsel %vm1525_vm8, 1.0, %v3729_v34  ;;  %v760_v41 = vpop.permute.xlu1 %759  ;;  %vm1189_vm8 = vmand %vm3475_vm6, %vm1125_vm2  ;;  %1858 = vpush %v270_v11  ;;  %vm645_vm6 = vcmp.eq.f32.partialorder %v3868_v21, %v2417_v31 }
 0x217   : > { %v1665_v57 = vadd.f32 %v1664_v22, %v1589_v17  ;;  %vm853_vm11 = vcmp.eq.f32.partialorder %v760_v41, %v2420_v19  ;;  %vm1463_vm14 = vmand %vm1189_vm8, %vm1399_vm1  ;;  %v1637_v17 = vadd.f32 %v1636_v51, %v3413_v53 }
 0x218   : > { %vm917_vm5 = vmand %vm643_vm0, %vm853_vm11 }
 0x219   : > { %vm1527_vm11 = vmand %vm1463_vm14, %vm365_vm15  ;;  %v1050_v50 = vpop.permute.xlu0 %1049  ;;  %vm3870_vm15 = vnez %v3869_v6  ;;  %v1638_v47 = vrot.slane %v1637_v17, 2  ;;  %v1734_v6 = vstv %s240_s17 }
 0x21a   : > { %v1034_v12 = vpop.permute.xlu1 %1033  ;;  %v1591_v37 = vsel %vm1527_vm11, 1.0, %v3729_v34  ;;  %vm859_vm11 = vcmp.eq.f32.partialorder %v3871_v49, %v2420_v19 }
 0x21b   : > { %vm1127_vm10 = vcmp.eq.f32.partialorder %v1034_v12, %v2470_v28  ;;  %v1666_v40 = vadd.f32 %v1665_v57, %v1591_v37  ;;  %v3876_v37 = vld [vmem:[#allocation25_spill] sm:$0xff] }
 0x21c   : > { %vm1191_vm4 = vmand %vm917_vm5, %vm1127_vm10 }
 0x21d   : > { %vm1465_vm12 = vmand %vm1191_vm4, %vm1401_vm3  ;;  %vm369_vm3 = vcmp.lt.s32.totalorder %v306_v20, %v3346_v24 }
 0x21e   : > { %vm1529_vm9 = vmand %vm1465_vm12, %vm367_vm7  ;;  %v764_v59 = vpop.permute.xlu1 %763  ;;  %v1324_v32 = vpop.permute.xlu0 %1323 }
 0x21f   : > { %v1593_v35 = vsel %vm1529_vm9, 1.0, %v3729_v34  ;;  %vm855_vm13 = vcmp.eq.f32.partialorder %v764_v59, %v2420_v19  ;;  %vm371_vm9 = vcmp.lt.s32.totalorder %v307_v0, %v3346_v24 }
 0x220   : > { %v1667_v56 = vadd.f32 %v1666_v40, %v1593_v35  ;;  %vm919_vm7 = vmand %vm645_vm6, %vm855_vm13  ;;  %vm651_vm6 = vcmp.eq.f32.partialorder %v3873_v7, %v2417_v31  ;;  %v3877_v35 = vld [vmem:[#allocation26_spill] sm:$0xff] }
 0x222   : > { %v1038_v23 = vpop.permute.xlu1 %1037 }
 0x223   : > { %vm1129_vm0 = vcmp.eq.f32.partialorder %v1038_v23, %v2470_v28 }
 0x224   : > { %vm1193_vm10 = vmand %vm919_vm7, %vm1129_vm0  ;;  %vm649_vm0 = vcmp.eq.f32.partialorder %v3872_v62, %v2417_v31  ;;  %v1743_v62 = vstv %s220_s23 }
 0x226   : > { %v1312_v26 = vpop.permute.xlu1 %1311 }
 0x227   : > { %vm1403_vm5 = vcmp.eq.f32.partialorder %v1312_v26, %v2482_v14 }
 0x228   : > { %vm1467_vm4 = vmand %vm1193_vm10, %vm1403_vm5  ;;  %vm1409_vm10 = vcmp.eq.f32.partialorder %v1324_v32, %v2482_v14 }
 0x229   : > { %vm1531_vm2 = vmand %vm1467_vm4, %vm369_vm3  ;;  %vm1133_vm3 = vcmp.eq.f32.partialorder %v1046_v55, %v2470_v28  ;;  %vm1135_vm4 = vcmp.eq.f32.partialorder %v1050_v50, %v2470_v28 }
 0x22a   : > { %v1042_v16 = vpop.permute.xlu1 %1041  ;;  %v1595_v44 = vsel %vm1531_vm2, 1.0, %v3729_v34  ;;  %vm923_vm5 = vmand %vm649_vm0, %vm859_vm11 }
 0x22b   : > { %vm1131_vm12 = vcmp.eq.f32.partialorder %v1042_v16, %v2470_v28  ;;  %v1668_v15 = vadd.f32 %v1667_v56, %v1595_v44 }
 0x22c   : > { %vm1195_vm1 = vmand %vm3870_vm15, %vm1131_vm12  ;;  %vm375_vm12 = vcmp.lt.s32.totalorder %v309_v33, %v3346_v24 }
 0x22e   : > { %v1316_v25 = vpop.permute.xlu1 %1315 }
 0x22f   : > { %vm1405_vm8 = vcmp.eq.f32.partialorder %v1316_v25, %v2482_v14 }
 0x230   : > { %vm1469_vm14 = vmand %vm1195_vm1, %vm1405_vm8  ;;  %vm373_vm8 = vcmp.lt.s32.totalorder %v308_v27, %v3346_v24 }
 0x231   : > { %vm1533_vm13 = vmand %vm1469_vm14, %vm371_vm9 }
 0x232   : > { %v1597_v52 = vsel %vm1533_vm13, 1.0, %v3729_v34  ;;  %v776_v4 = vpop.permute.xlu1 %775  ;;  %vm1197_vm1 = vmand %vm923_vm5, %vm1133_vm3  ;;  %vm377_vm3 = vcmp.lt.s32.totalorder %v310_v63, %v3346_v24  ;;  %v1684_v24 = vunpack.c.0.s8 %v1683_v13 }
 0x233   : > { %v1669_v9 = vadd.f32 %v1668_v15, %v1597_v52  ;;  %vm861_vm7 = vcmp.eq.f32.partialorder %v776_v4, %v2420_v19  ;;  %v1737_v15 = vstv %s182_s8  ;;  %v1740_v52 = vstv %s201_s22 }
 0x234   : > { %vm925_vm2 = vmand %vm651_vm6, %vm861_vm7  ;;  %vm653_vm7 = vcmp.eq.f32.partialorder %v3874_v60, %v2417_v31  ;;  %v1687_v12 = vsub.s32 %v1684_v24, %v2285_v61 }
 0x235   : > { %vm1199_vm9 = vmand %vm925_vm2, %vm1135_vm4 }
 0x236   : > { %vm1473_vm15 = vmand %vm1199_vm9, %vm1409_vm10  ;;  %v1320_v43 = vpop.permute.xlu1 %1319 }
 0x237   : > { %vm1537_vm14 = vmand %vm1473_vm15, %vm375_vm12  ;;  %vm1407_vm11 = vcmp.eq.f32.partialorder %v1320_v43, %v2482_v14  ;;  %vm3875_vm15 = vnez %v3810_v38 }
 0x238   : > { %vm1471_vm13 = vmand %vm1197_vm1, %vm1407_vm11  ;;  %v1601_v22 = vsel %vm1537_vm14, 1.0, %v3729_v34  ;;  %vm1727_vm14 = vcmp.eq.s32.totalorder %v2691_v2, 0  ;;  %vm1730_vm11 = vcmp.eq.s32.totalorder %v2691_v2, 1 }
 0x239   : > { %vm1535_vm0 = vmand %vm1471_vm13, %vm373_vm8  ;;  %vm1714_vm8 = vcmask 1040384   ;;  %vm1733_vm13 = vcmp.eq.s32.totalorder %v2691_v2, 2 }
 0x23a   : > { %v1599_v10 = vsel %vm1535_vm0, 1.0, %v3729_v34  ;;  %v780_v46 = vpop.permute.xlu1 %779  ;;  %vm1736_vm0 = vcmp.eq.s32.totalorder %v2691_v2, 3 }
 0x23b   : > { %v1670_v42 = vadd.f32 %v1669_v9, %v1599_v10  ;;  %vm863_vm6 = vcmp.eq.f32.partialorder %v780_v46, %v2420_v19 }
 0x23c   : > { %vm927_vm10 = vmand %vm653_vm7, %vm863_vm6  ;;  %vm1739_vm6 = vcmp.eq.s32.totalorder %v2691_v2, 4 }
 0x23d   : > { %v1671_v36 = vadd.f32 %v1670_v42, %v1601_v22 }
 0x23e   : > { %v1054_v5 = vpop.permute.xlu1 %1053 }
 0x23f   : > { %vm1137_vm5 = vcmp.eq.f32.partialorder %v1054_v5, %v2470_v28  ;;  %v1639_v28 = vadd.f32 %v1638_v47, %v1637_v17 }
 0x240   : > { %vm1201_vm4 = vmand %vm927_vm10, %vm1137_vm5  ;;  %vm1742_vm5 = vcmp.eq.s32.totalorder %v2691_v2, 5 }
 0x241   : > { %v1640_v54 = vrot.slane %v1639_v28, 1 }
 0x243   : > { %v1328_v18 = vpop.permute.xlu1 %1327  ;;  %v1641_v53 = vadd.f32 %v1640_v54, %v1639_v28 }
 0x244   : > { %vm1411_vm2 = vcmp.eq.f32.partialorder %v1328_v18, %v2482_v14 }
 0x245   : > { %vm1475_vm12 = vmand %vm1201_vm4, %vm1411_vm2 }
 0x246   : > { %vm1539_vm9 = vmand %vm1475_vm12, %vm377_vm3 }
 0x247   : > { %v1603_v57 = vsel %vm1539_vm9, 1.0, %v3729_v34  ;;  %s1859_s7 = spop %1858 }
 0x248   : > { %v1672_v19 = vadd.f32 %v1671_v36, %v1603_v57  ;;  %s272_s16 = smul.f32 0.25, %s1859_s7 }
 0x24a   : > { %v1673_v41 = vrot.slane %v1672_v19, 4  ;;  %v1731_v44 = vstv %s272_s16 }
 0x24c   : > { %v1674_v31 = vadd.f32 %v1673_v41, %v1672_v19 }
 0x24e   : > { %v1675_v30 = vrot.slane %v1674_v31, 2 }
 0x250   : > { %v1676_v45 = vadd.f32 %v1675_v30, %v1674_v31 }
 0x252   : > { %v1677_v3 = vrot.slane %v1676_v45, 1 }
 0x254   : > { %v1678_v14 = vadd.f32 %v1677_v3, %v1676_v45 }
 0x256   : > { %v1681_v39 = vcombine.low %v1641_v53, %v1678_v14 }
 0x258   : > { %v1688_v8 = vrot.slane %v1681_v39, %v1687_v12 }
 0x25a   : > { %v1695_v48 = vrot.slane %v1688_v8, %v1687_v12 }
 0x25c   : > { %v1697_v11 = vadd.f32 %v1695_v48, %v1604_v1 }
 0x25e   : > { %1698 = vst.msk [vmem:[#allocation2] sm:$0x3] %vm3875_vm15, %v1697_v11 }
 0x265   : > { %v1699_v29 = vld [vmem:[#allocation2] sm:$0x3] }
 0x266   : > { %vm1700_vm1 = vcmp.eq.f32.partialorder %v1699_v29, 0.0 }
 0x267   : > { %v1843_v59 = vsel %vm1700_vm1, 1.0, %v3729_v34 }
 0x268   : > { %v1707_v40 = vrot.slane %v1843_v59, %v3876_v37  ;;  %v1711_v23 = vrot.slane %v1843_v59, %v3877_v35 }
 0x26a   : > { %v1715_v56 = vsel %vm1714_vm8, %v1707_v40, 0.0  ;;  %v1716_v61 = vsel %vm1714_vm8, %v1711_v23, 0.0 }
 0x26b   : > { %v1717_v20 = vadd.f32 %v1716_v61, %v1715_v56 }
 0x26d   : > { %1718 = vadd.xlane.f32.xlu0 %v1717_v20 }
 0x2fa   : > { %v1719_v26 = vpop.xlane.xlu0 %1718 }
 0x2fb   : > { %v1720_v21 = vrot.slane %v1719_v26, 4 }
 0x2fd   : > { %v1721_v55 = vadd.f32 %v1720_v21, %v1719_v26 }
 0x2ff   : > { %v1722_v38 = vrot.slane %v1721_v55, 2 }
 0x301   : > { %v1723_v16 = vadd.f32 %v1722_v38, %v1721_v55 }
 0x303   : > { %v1724_v0 = vrot.slane %v1723_v16, 1 }
 0x305   : > { %v1725_v50 = vadd.f32 %v1724_v0, %v1723_v16 }
 0x307   : > { %1860 = vpush %v1725_v50 }
 0x338   : > { %s1861_s21 = spop %1860 }
 0x339   : > { %v1728_v34 = vstv %s1861_s21 }
 0x33a   : > { %v1729_v25 = vsel %vm1727_vm14, %v1728_v34, 0.0 }
 0x33b   : > { %v1732_v49 = vsel %vm1730_vm11, %v1731_v44, %v1729_v25 }
 0x33c   : > { %v1735_v32 = vsel %vm1733_vm13, %v1734_v6, %v1732_v49 }
 0x33d   : > { %v1738_v33 = vsel %vm1736_vm0, %v1737_v15, %v1735_v32 }
 0x33e   : > { %v1741_v9 = vsel %vm1739_vm6, %v1740_v52, %v1738_v33 }
 0x33f   : > { %v1744_v4 = vsel %vm1742_vm5, %v1743_v62, %v1741_v9 }
 0x340   : > { %1745 = vst [vmem:[%s151_s25] sm:$0xff] %v1744_v4 }
 0x341   : > { %1966 = shalt.err (!%p1963_p3)
}
 0x342   : > { %s1967_s6 = scalar_lea.hbm %s3559_s29, 128  ;;  %s1971_s14 = scalar_lea.hbm %s3605_s2, 256 }
 0x343   : > { %p1968_p4 = scmp.ne.s32.totalorder %s3559_s29, %s1967_s6  ;;  %p1972_p9 = scmp.lt.u32.totalorder %s3559_s29, %s3605_s2 }
 0x344   : > { %p1973_p10 = scmp.lt.u32.totalorder %s1971_s14, %s1967_s6  ;;  %p1975_p12 = scmp.lt.u32.totalorder %s1967_s6, %s3559_s29 }
 0x345   : > { %p1969_p7 = pnand %p1968_p4, %p2078_p5 }
 0x346   : > { %p1974_p11 = por %p1973_p10, %p1972_p9 }
 0x347   : > { %p1970_p8 = pneg %p1969_p7 }
 0x348   : > { %p1976_p13 = por %p1975_p12, %p1974_p11 }
 0x34a   : > { %p1977_p0 = pnand %p1976_p13, %p1970_p8 }
 0x34c   : > { %1980 = shalt.err (!%p1977_p0)
}
 0x34d   : > { %1862 = dma.vmem_to_hbm [thread:$0]  (%p2078_p5), %s3561_s26, 128, %s3559_s29, %s1747_s13  }
 0x34e PF: > { %p1868_p1 = scmp.ge.s32.totalorder %s2015_s12, 2  ;;  %s1772_s21 = sand.u32 1, %s2003_s9  }
 0x34f   : > { %s1773_s22 = scalar_lea.sflag [#allocation4], %s1772_s21 }
 0x350   : > { %p1865_p2 = pnand %p1868_p1, %p2082_p6 }
 0x352   : > { %1998 = dma.done.wait (!%p1865_p2), %s1773_s22, 128  }
 0x353   : > { %2000 = vsyncadd (!%p1865_p2), %s1773_s22, 4294967168  ;;  %p12_p3 = scmp.ge.s32.totalorder %s2065_s15, 4   ;;  %s3878_s9 = smov %s2007_s10 }
 0x354   : > { %s3879_s10 = smov %s2011_s11  ;;  %s3880_s11 = smov %s2076_s18 }
 0x355   : > { %s3881_s12 = smov %s2065_s15  ;;  %14 = sbr.rel (!%p12_p3) target bundleno = 3 (0x3), region = 66 }
 0x35c   :  { %1778 = vsyncpa [#allocation4], 1 }
 0x35d   :  { %1780 = vsyncpa [#allocation4 + $0x1], 1 }

</bundles_post_ra>
